<compile_context>
chip_gen: v7x
topology: tpu7x:2x2x1
jax: 0.10.0
libtpu: 0.0.40
codegen_flags: <defaults>
</compile_context>

<pallas_src>
import functools
import math

import jax
import jax.numpy as jnp
import numpy as np
from jax.experimental import pallas as pl
from jax.experimental.pallas import tpu as pltpu


# --------------------------------------------------------------------------
# Kernel
# --------------------------------------------------------------------------
def _self_attention_kernel(x_ref, mask_ref,
                           wqkv_ref, bqkv_ref,
                           wout_ref, bout_ref,
                           lng_ref, lnb_ref,
                           o_ref, *rest,
                           nheads, with_attn):
    if with_attn:
        attn_ref, osc_ref = rest
    else:
        (osc_ref,) = rest

    f32 = jnp.float32
    bf16 = jnp.bfloat16

    xb = x_ref[...]                           # [Bb, L, C] f32 (kept for residual)
    Bb, L, C = xb.shape
    dh = C // nheads
    R = Bb * L
    x2d = xb.reshape(R, C)

    # Single fused projection (q|k|v proj composed with MHA in_proj, query
    # scale folded in, pre-transposed host-side).  bf16 MXU, f32 accumulate.
    qkv = jnp.dot(x2d.astype(bf16), wqkv_ref[...],
                  preferred_element_type=f32) + bqkv_ref[...]      # [R, 3C] f32

    # Additive key-padding bias (mask: 1.0 = valid key).  Kept in f32.
    valid = mask_ref[...] > 0.5                                    # [Bb, 1, L]
    kbias = jnp.where(valid, 0.0, -1e30).astype(f32)

    inv_h = 1.0 / nheads
    # TODO(synk): for large C, pad each per-head segment to a 128-lane
    # multiple host-side so these slices / scratch stores are tile-aligned.
    for h in range(nheads):                   # static loop, H small
        qh = qkv[:, h * dh:(h + 1) * dh].reshape(Bb, L, dh).astype(bf16)
        kh = qkv[:, C + h * dh:C + (h + 1) * dh].reshape(Bb, L, dh).astype(bf16)
        vh = qkv[:, 2 * C + h * dh:2 * C + (h + 1) * dh].reshape(Bb, L, dh).astype(bf16)

        s = jnp.einsum('bqd,bkd->bqk', qh, kh, preferred_element_type=f32)
        s = s + kbias                         # key_padding_mask
        s = s - jnp.max(s, axis=-1, keepdims=True)
        p = jnp.exp(s)                        # f32
        p = p * pl.reciprocal(jnp.sum(p, axis=-1, keepdims=True), approx=True)

        oh = jnp.einsum('bqk,bkd->bqd', p.astype(bf16), vh,
                        preferred_element_type=f32)               # [Bb, L, dh]
        osc_ref[:, h * dh:(h + 1) * dh] = oh.reshape(R, dh).astype(bf16)

        if with_attn:
            # average_attn_weights=True (PyTorch default)
            if h == 0:
                attn_ref[...] = (p * inv_h).astype(attn_ref.dtype)
            else:
                attn_ref[...] += (p * inv_h).astype(attn_ref.dtype)

    # Out-projection straight from the bf16 head-output scratch.
    upd = jnp.dot(osc_ref[...], wout_ref[...],
                  preferred_element_type=f32) + bout_ref[...]      # [R, C] f32

    # dropout = identity (eval); residual + LayerNorm in f32.
    hres = x2d + upd
    mu = jnp.mean(hres, axis=-1, keepdims=True)
    var = jnp.mean((hres - mu) * (hres - mu), axis=-1, keepdims=True)
    y = (hres - mu) * jax.lax.rsqrt(var + 1e-5) * lng_ref[...] + lnb_ref[...]

    o_ref[...] = y.reshape(Bb, L, C).astype(o_ref.dtype)


# --------------------------------------------------------------------------
# Wrapper
# --------------------------------------------------------------------------
def _pick_block_b(B, L, target_rows=512):
    """Largest divisor of B with <= ~target_rows rows/step, capped at B//2
    (keeps >=2 grid steps so the parallel axis shards across v7x's 2 TCs)."""
    want = max(1, target_rows // max(L, 1))
    if B >= 2:
        want = min(want, max(1, B // 2))
    best = 1
    for d in range(1, B + 1):
        if B % d == 0 and d <= want:
            best = d
    return best


def self_attention(x, mask, fused_params, nheads, *, block_b=None, with_attn=True):
    """x: [B, L, C] f32; mask: [B, L] (1 = valid key) or None."""
    B, L, C = x.shape
    if mask is None:
        mask = jnp.ones((B, L), jnp.float32)
    if block_b is None:
        block_b = _pick_block_b(B, L)
    assert B % block_b == 0
    grid_b = B // block_b
    mask3 = mask.reshape(B, 1, L).astype(jnp.float32)

    def rep_spec(shape):
        # Grid-invariant block: constant index_map -> single-buffer it.
        n = len(shape)
        return pl.BlockSpec(shape, lambda i, n=n: (0,) * n,
                            pipeline_mode=pl.Buffered(1))

    in_specs = [
        pl.BlockSpec((block_b, L, C), lambda i: (i, 0, 0)),
        pl.BlockSpec((block_b, 1, L), lambda i: (i, 0, 0)),
    ] + [rep_spec(p.shape) for p in fused_params]

    if with_attn:
        out_shape = (jax.ShapeDtypeStruct((B, L, C), jnp.float32),
                     jax.ShapeDtypeStruct((B, L, L), jnp.float32))
        out_specs = (pl.BlockSpec((block_b, L, C), lambda i: (i, 0, 0)),
                     pl.BlockSpec((block_b, L, L), lambda i: (i, 0, 0)))
    else:
        out_shape = jax.ShapeDtypeStruct((B, L, C), jnp.float32)
        out_specs = pl.BlockSpec((block_b, L, C), lambda i: (i, 0, 0))

    kernel = functools.partial(_self_attention_kernel,
                               nheads=nheads, with_attn=with_attn)
    return pl.pallas_call(
        kernel,
        grid=(grid_b,),
        in_specs=in_specs,
        out_specs=out_specs,
        out_shape=out_shape,
        scratch_shapes=[pltpu.VMEM((block_b * L, C), jnp.bfloat16)],
        compiler_params=pltpu.CompilerParams(
            dimension_semantics=("parallel",),
            vmem_limit_bytes=64 << 20),
    )(x, mask3, *fused_params)


# --------------------------------------------------------------------------
# Parameters (PyTorch layout) + offline fusion for the kernel
# --------------------------------------------------------------------------
def init_params(key, C):
    """PyTorch-layout params: q/k/v_proj, MHA in_proj, out_proj, LayerNorm."""
    ks = jax.random.split(key, 10)
    bd = 1.0 / math.sqrt(C)
    u = lambda k, shape: jax.random.uniform(k, shape, jnp.float32, -bd, bd)
    wq, bq = u(ks[0], (C, C)), u(ks[1], (C,))
    wk, bk = u(ks[2], (C, C)), u(ks[3], (C,))
    wv, bv = u(ks[4], (C, C)), u(ks[5], (C,))
    in_w, in_b = u(ks[6], (3 * C, C)), u(ks[7], (3 * C,))       # MHA in_proj
    out_w, out_b = u(ks[8], (C, C)), u(ks[9], (C,))             # MHA out_proj
    ln_g = jnp.ones((C,), jnp.float32)
    ln_b = jnp.zeros((C,), jnp.float32)
    return (wq, bq, wk, bk, wv, bv, in_w, in_b, out_w, out_b, ln_g, ln_b)


def fuse_params(params, nheads):
    """Offline fusion: (x W^T + b) Wi^T + bi == x (Wi W)^T + (b Wi^T + bi);
    q gets the 1/sqrt(dh) scale folded in; weights pre-transposed, packed
    into one [C, 3C] matrix, and stored in bf16 (biases stay f32)."""
    (wq, bq, wk, bk, wv, bv, in_w, in_b, out_w, out_b, ln_g, ln_b) = params
    C = wq.shape[0]
    dh = C // nheads
    scale = 1.0 / math.sqrt(dh)
    in_wq, in_wk, in_wv = in_w[:C], in_w[C:2 * C], in_w[2 * C:]
    in_bq, in_bk, in_bv = in_b[:C], in_b[C:2 * C], in_b[2 * C:]

    wq_eff = (in_wq @ wq) * scale
    bq_eff = (bq @ in_wq.T + in_bq) * scale
    wk_eff = in_wk @ wk
    bk_eff = bk @ in_wk.T + in_bk
    wv_eff = in_wv @ wv
    bv_eff = bv @ in_wv.T + in_bv

    w_qkv_t = jnp.concatenate([wq_eff, wk_eff, wv_eff], axis=0).T   # [C, 3C]
    b_qkv = jnp.concatenate([bq_eff, bk_eff, bv_eff], axis=0).reshape(1, 3 * C)
    return (w_qkv_t.astype(jnp.bfloat16), b_qkv,
            out_w.T.astype(jnp.bfloat16), out_b.reshape(1, C),
            ln_g.reshape(1, C), ln_b.reshape(1, C))


# --------------------------------------------------------------------------
# Pure-JAX reference (mirrors the PyTorch forward, eval mode, unfused params)
# --------------------------------------------------------------------------
def reference(x, mask, params, nheads):
    (wq, bq, wk, bk, wv, bv, in_w, in_b, out_w, out_b, ln_g, ln_b) = params
    B, L, C = x.shape
    dh = C // nheads
    q = x @ wq.T + bq
    k = x @ wk.T + bk
    v = x @ wv.T + bv
    in_wq, in_wk, in_wv = in_w[:C], in_w[C:2 * C], in_w[2 * C:]
    in_bq, in_bk, in_bv = in_b[:C], in_b[C:2 * C], in_b[2 * C:]
    q = q @ in_wq.T + in_bq
    k = k @ in_wk.T + in_bk
    v = v @ in_wv.T + in_bv
    qh = q.reshape(B, L, nheads, dh).transpose(0, 2, 1, 3)
    kh = k.reshape(B, L, nheads, dh).transpose(0, 2, 1, 3)
    vh = v.reshape(B, L, nheads, dh).transpose(0, 2, 1, 3)
    s = jnp.einsum('bhld,bhsd->bhls', qh, kh) / math.sqrt(dh)
    s = jnp.where(mask[:, None, None, :] > 0.5, s, -1e30)
    p = jax.nn.softmax(s, axis=-1)
    o = jnp.einsum('bhls,bhsd->bhld', p, vh).transpose(0, 2, 1, 3).reshape(B, L, C)
    upd = o @ out_w.T + out_b
    h = x + upd
    mu = h.mean(-1, keepdims=True)
    var = ((h - mu) ** 2).mean(-1, keepdims=True)
    y = (h - mu) / jnp.sqrt(var + 1e-5) * ln_g + ln_b
    return y, p.mean(axis=1)


if __name__ == "__main__":
    B, L, C, H = 2, 8, 32, 4          # hdim=32, nheads=4, head_dim=8
    key = jax.random.PRNGKey(0)
    k_x, k_p = jax.random.split(key, 2)
    x = jax.random.normal(k_x, (B, L, C), jnp.float32)
    # mask: 1 = valid token (forward uses key_padding_mask = ~mask)
    mask = jnp.ones((B, L), jnp.float32).at[1, L - 3:].set(0.0)

    params = init_params(k_p, C)
    fused = fuse_params(params, H)

    out, attn = self_attention(x, mask, fused, H)
    jax.block_until_ready((out, attn))

    # Also exercise the attn-free (lane-dense writeback) inference path.
    out_noattn = self_attention(x, mask, fused, H, with_attn=False)
    jax.block_until_ready(out_noattn)

    ref_out, ref_attn = reference(x, mask, params, H)
    # bf16 MXU operands + approx reciprocal in the softmax => relaxed tolerance
    assert np.allclose(np.asarray(out), np.asarray(ref_out), atol=2e-2, rtol=2e-2)
    assert np.allclose(np.asarray(attn), np.asarray(ref_attn), atol=2e-2, rtol=2e-2)
    assert np.allclose(np.asarray(out_noattn), np.asarray(ref_out), atol=2e-2, rtol=2e-2)
    print("KERNEL_OK")
</pallas_src>

<mosaic_0001>
module attributes {stable_mosaic.version = 11 : i64} {
  func.func @_self_attention_kernel(%arg0: i32, %arg1: memref<1x8x32xf32, #tpu.memory_space<vmem>>, %arg2: memref<1x1x8xf32, #tpu.memory_space<vmem>>, %arg3: memref<32x96xbf16, #tpu.memory_space<vmem>>, %arg4: memref<1x96xf32, #tpu.memory_space<vmem>>, %arg5: memref<32x32xbf16, #tpu.memory_space<vmem>>, %arg6: memref<1x32xf32, #tpu.memory_space<vmem>>, %arg7: memref<1x32xf32, #tpu.memory_space<vmem>>, %arg8: memref<1x32xf32, #tpu.memory_space<vmem>>, %arg9: memref<1x8x32xf32, #tpu.memory_space<vmem>>, %arg10: memref<1x8x8xf32, #tpu.memory_space<vmem>>, %arg11: memref<8x32xbf16, #tpu.memory_space<vmem>>) attributes {dimension_semantics = [#tpu.dimension_semantics<parallel>], iteration_bounds = array<i64: 2>, scalar_prefetch = 0 : i64, scratch_operands = 1 : i64, tpu.core_type = #tpu.core_type<tc>, window_params = [{transform_indices = @transform_0, window_bounds = array<i64: 1, 8, 32>}, {transform_indices = @transform_1, window_bounds = array<i64: 1, 1, 8>}, {pipeline_mode = #tpu.pipeline_mode<synchronous>, transform_indices = @transform_2, window_bounds = array<i64: 32, 96>}, {pipeline_mode = #tpu.pipeline_mode<synchronous>, transform_indices = @transform_3, window_bounds = array<i64: 1, 96>}, {pipeline_mode = #tpu.pipeline_mode<synchronous>, transform_indices = @transform_4, window_bounds = array<i64: 32, 32>}, {pipeline_mode = #tpu.pipeline_mode<synchronous>, transform_indices = @transform_5, window_bounds = array<i64: 1, 32>}, {pipeline_mode = #tpu.pipeline_mode<synchronous>, transform_indices = @transform_6, window_bounds = array<i64: 1, 32>}, {pipeline_mode = #tpu.pipeline_mode<synchronous>, transform_indices = @transform_7, window_bounds = array<i64: 1, 32>}, {transform_indices = @transform_8, window_bounds = array<i64: 1, 8, 32>}, {transform_indices = @transform_9, window_bounds = array<i64: 1, 8, 8>}]} {
    %c0 = arith.constant 0 : index
    %c0_0 = arith.constant 0 : index
    %c0_1 = arith.constant 0 : index
    %0 = vector.load %arg1[%c0, %c0_0, %c0_1] : memref<1x8x32xf32, #tpu.memory_space<vmem>>, vector<1x8x32xf32>
    %1 = vector.shape_cast %0 : vector<1x8x32xf32> to vector<8x32xf32>
    %2 = arith.truncf %1 : vector<8x32xf32> to vector<8x32xbf16>
    %c0_2 = arith.constant 0 : index
    %c0_3 = arith.constant 0 : index
    %3 = vector.load %arg3[%c0_2, %c0_3] : memref<32x96xbf16, #tpu.memory_space<vmem>>, vector<32x96xbf16>
    %cst = arith.constant dense<0.000000e+00> : vector<8x96xf32>
    %4 = tpu.matmul %2, %3, %cst {dimension_numbers = #tpu.dot_dimension_numbers<[1], [0], [0], [1], [0, 0, 1, 1], [], []>} : vector<8x32xbf16>, vector<32x96xbf16>, vector<8x96xf32> -> vector<8x96xf32>
    %c0_4 = arith.constant 0 : index
    %c0_5 = arith.constant 0 : index
    %5 = vector.load %arg4[%c0_4, %c0_5] : memref<1x96xf32, #tpu.memory_space<vmem>>, vector<1x96xf32>
    %6 = vector.broadcast %5 : vector<1x96xf32> to vector<8x96xf32>
    %7 = arith.addf %4, %6 : vector<8x96xf32>
    %c0_6 = arith.constant 0 : index
    %c0_7 = arith.constant 0 : index
    %c0_8 = arith.constant 0 : index
    %8 = vector.load %arg2[%c0_6, %c0_7, %c0_8] : memref<1x1x8xf32, #tpu.memory_space<vmem>>, vector<1x1x8xf32>
    %cst_9 = arith.constant 5.000000e-01 : f32
    %9 = vector.broadcast %cst_9 : f32 to vector<1x1x8xf32>
    %10 = arith.cmpf ogt, %8, %9 : vector<1x1x8xf32>
    %cst_10 = arith.constant 0.000000e+00 : f32
    %cst_11 = arith.constant -1.000000e+30 : f32
    %11 = vector.broadcast %cst_10 : f32 to vector<1x1x8xf32>
    %12 = vector.broadcast %cst_11 : f32 to vector<1x1x8xf32>
    %13 = arith.select %10, %11, %12 : vector<1x1x8xi1>, vector<1x1x8xf32>
    %14 = vector.extract_strided_slice %7 {offsets = [0, 0], sizes = [8, 8], strides = [1, 1]} : vector<8x96xf32> to vector<8x8xf32>
    %15 = vector.shape_cast %14 : vector<8x8xf32> to vector<1x8x8xf32>
    %16 = arith.truncf %15 : vector<1x8x8xf32> to vector<1x8x8xbf16>
    %17 = vector.extract_strided_slice %7 {offsets = [0, 32], sizes = [8, 8], strides = [1, 1]} : vector<8x96xf32> to vector<8x8xf32>
    %18 = vector.shape_cast %17 : vector<8x8xf32> to vector<1x8x8xf32>
    %19 = arith.truncf %18 : vector<1x8x8xf32> to vector<1x8x8xbf16>
    %20 = vector.extract_strided_slice %7 {offsets = [0, 64], sizes = [8, 8], strides = [1, 1]} : vector<8x96xf32> to vector<8x8xf32>
    %21 = vector.shape_cast %20 : vector<8x8xf32> to vector<1x8x8xf32>
    %22 = arith.truncf %21 : vector<1x8x8xf32> to vector<1x8x8xbf16>
    "tpu.trace_start"() <{level = 10 : i32, message = "bqd,bkd->bqk"}> : () -> ()
    %cst_12 = arith.constant dense<0.000000e+00> : vector<1x8x8xf32>
    %23 = tpu.matmul %16, %19, %cst_12 {dimension_numbers = #tpu.dot_dimension_numbers<[2], [2], [1], [1], [0, 0, 0, 1, 1, 1], [0], [0]>} : vector<1x8x8xbf16>, vector<1x8x8xbf16>, vector<1x8x8xf32> -> vector<1x8x8xf32>
    "tpu.trace_stop"() : () -> ()
    %24 = vector.broadcast %13 : vector<1x1x8xf32> to vector<1x8x8xf32>
    %25 = arith.addf %23, %24 : vector<1x8x8xf32>
    %cst_13 = arith.constant dense<0xFF800000> : vector<1x8xf32>
    %26 = vector.multi_reduction <maximumf>, %25, %cst_13 [2] : vector<1x8x8xf32> to vector<1x8xf32>
    %27 = vector.shape_cast %26 : vector<1x8xf32> to vector<1x8x1xf32>
    %28 = vector.broadcast %27 : vector<1x8x1xf32> to vector<1x8x8xf32>
    %29 = arith.subf %25, %28 : vector<1x8x8xf32>
    %30 = math.exp %29 : vector<1x8x8xf32>
    %cst_14 = arith.constant dense<0.000000e+00> : vector<1x8xf32>
    %31 = vector.multi_reduction <add>, %30, %cst_14 [2] : vector<1x8x8xf32> to vector<1x8xf32>
    %32 = vector.shape_cast %31 : vector<1x8xf32> to vector<1x8x1xf32>
    %33 = tpu.reciprocal %32 {approx = true} : vector<1x8x1xf32> -> vector<1x8x1xf32>
    %34 = vector.broadcast %33 : vector<1x8x1xf32> to vector<1x8x8xf32>
    %35 = arith.mulf %30, %34 : vector<1x8x8xf32>
    %36 = arith.truncf %35 : vector<1x8x8xf32> to vector<1x8x8xbf16>
    "tpu.trace_start"() <{level = 10 : i32, message = "bqk,bkd->bqd"}> : () -> ()
    %cst_15 = arith.constant dense<0.000000e+00> : vector<1x8x8xf32>
    %37 = tpu.matmul %36, %22, %cst_15 {dimension_numbers = #tpu.dot_dimension_numbers<[2], [1], [1], [2], [0, 0, 0, 1, 1, 2], [0], [0]>} : vector<1x8x8xbf16>, vector<1x8x8xbf16>, vector<1x8x8xf32> -> vector<1x8x8xf32>
    "tpu.trace_stop"() : () -> ()
    %38 = vector.shape_cast %37 : vector<1x8x8xf32> to vector<8x8xf32>
    %39 = arith.truncf %38 : vector<8x8xf32> to vector<8x8xbf16>
    %c0_16 = arith.constant 0 : index
    %c0_17 = arith.constant 0 : index
    %40 = vector.load %arg11[%c0_16, %c0_17] : memref<8x32xbf16, #tpu.memory_space<vmem>>, vector<8x8xbf16>
    tpu.vector_store %arg11[%c0_16, %c0_17], %39 {strides = array<i32>} : memref<8x32xbf16, #tpu.memory_space<vmem>>, vector<8x8xbf16>,
    %cst_18 = arith.constant 2.500000e-01 : f32
    %41 = vector.broadcast %cst_18 : f32 to vector<1x8x8xf32>
    %42 = arith.mulf %35, %41 : vector<1x8x8xf32>
    %c0_19 = arith.constant 0 : index
    %c0_20 = arith.constant 0 : index
    %c0_21 = arith.constant 0 : index
    %43 = vector.load %arg10[%c0_19, %c0_20, %c0_21] : memref<1x8x8xf32, #tpu.memory_space<vmem>>, vector<1x8x8xf32>
    tpu.vector_store %arg10[%c0_19, %c0_20, %c0_21], %42 {strides = array<i32>} : memref<1x8x8xf32, #tpu.memory_space<vmem>>, vector<1x8x8xf32>,
    %44 = vector.extract_strided_slice %7 {offsets = [0, 8], sizes = [8, 8], strides = [1, 1]} : vector<8x96xf32> to vector<8x8xf32>
    %45 = vector.shape_cast %44 : vector<8x8xf32> to vector<1x8x8xf32>
    %46 = arith.truncf %45 : vector<1x8x8xf32> to vector<1x8x8xbf16>
    %47 = vector.extract_strided_slice %7 {offsets = [0, 40], sizes = [8, 8], strides = [1, 1]} : vector<8x96xf32> to vector<8x8xf32>
    %48 = vector.shape_cast %47 : vector<8x8xf32> to vector<1x8x8xf32>
    %49 = arith.truncf %48 : vector<1x8x8xf32> to vector<1x8x8xbf16>
    %50 = vector.extract_strided_slice %7 {offsets = [0, 72], sizes = [8, 8], strides = [1, 1]} : vector<8x96xf32> to vector<8x8xf32>
    %51 = vector.shape_cast %50 : vector<8x8xf32> to vector<1x8x8xf32>
    %52 = arith.truncf %51 : vector<1x8x8xf32> to vector<1x8x8xbf16>
    "tpu.trace_start"() <{level = 10 : i32, message = "bqd,bkd->bqk"}> : () -> ()
    %cst_22 = arith.constant dense<0.000000e+00> : vector<1x8x8xf32>
    %53 = tpu.matmul %46, %49, %cst_22 {dimension_numbers = #tpu.dot_dimension_numbers<[2], [2], [1], [1], [0, 0, 0, 1, 1, 1], [0], [0]>} : vector<1x8x8xbf16>, vector<1x8x8xbf16>, vector<1x8x8xf32> -> vector<1x8x8xf32>
    "tpu.trace_stop"() : () -> ()
    %54 = vector.broadcast %13 : vector<1x1x8xf32> to vector<1x8x8xf32>
    %55 = arith.addf %53, %54 : vector<1x8x8xf32>
    %cst_23 = arith.constant dense<0xFF800000> : vector<1x8xf32>
    %56 = vector.multi_reduction <maximumf>, %55, %cst_23 [2] : vector<1x8x8xf32> to vector<1x8xf32>
    %57 = vector.shape_cast %56 : vector<1x8xf32> to vector<1x8x1xf32>
    %58 = vector.broadcast %57 : vector<1x8x1xf32> to vector<1x8x8xf32>
    %59 = arith.subf %55, %58 : vector<1x8x8xf32>
    %60 = math.exp %59 : vector<1x8x8xf32>
    %cst_24 = arith.constant dense<0.000000e+00> : vector<1x8xf32>
    %61 = vector.multi_reduction <add>, %60, %cst_24 [2] : vector<1x8x8xf32> to vector<1x8xf32>
    %62 = vector.shape_cast %61 : vector<1x8xf32> to vector<1x8x1xf32>
    %63 = tpu.reciprocal %62 {approx = true} : vector<1x8x1xf32> -> vector<1x8x1xf32>
    %64 = vector.broadcast %63 : vector<1x8x1xf32> to vector<1x8x8xf32>
    %65 = arith.mulf %60, %64 : vector<1x8x8xf32>
    %66 = arith.truncf %65 : vector<1x8x8xf32> to vector<1x8x8xbf16>
    "tpu.trace_start"() <{level = 10 : i32, message = "bqk,bkd->bqd"}> : () -> ()
    %cst_25 = arith.constant dense<0.000000e+00> : vector<1x8x8xf32>
    %67 = tpu.matmul %66, %52, %cst_25 {dimension_numbers = #tpu.dot_dimension_numbers<[2], [1], [1], [2], [0, 0, 0, 1, 1, 2], [0], [0]>} : vector<1x8x8xbf16>, vector<1x8x8xbf16>, vector<1x8x8xf32> -> vector<1x8x8xf32>
    "tpu.trace_stop"() : () -> ()
    %68 = vector.shape_cast %67 : vector<1x8x8xf32> to vector<8x8xf32>
    %69 = arith.truncf %68 : vector<8x8xf32> to vector<8x8xbf16>
    %c0_26 = arith.constant 0 : index
    %c8 = arith.constant 8 : index
    %70 = vector.load %arg11[%c0_26, %c8] : memref<8x32xbf16, #tpu.memory_space<vmem>>, vector<8x8xbf16>
    tpu.vector_store %arg11[%c0_26, %c8], %69 {strides = array<i32>} : memref<8x32xbf16, #tpu.memory_space<vmem>>, vector<8x8xbf16>,
    %c0_27 = arith.constant 0 : index
    %c0_28 = arith.constant 0 : index
    %c0_29 = arith.constant 0 : index
    %71 = vector.load %arg10[%c0_27, %c0_28, %c0_29] : memref<1x8x8xf32, #tpu.memory_space<vmem>>, vector<1x8x8xf32>
    %cst_30 = arith.constant 2.500000e-01 : f32
    %72 = vector.broadcast %cst_30 : f32 to vector<1x8x8xf32>
    %73 = arith.mulf %65, %72 : vector<1x8x8xf32>
    %74 = arith.addf %71, %73 : vector<1x8x8xf32>
    %c0_31 = arith.constant 0 : index
    %c0_32 = arith.constant 0 : index
    %c0_33 = arith.constant 0 : index
    %75 = vector.load %arg10[%c0_31, %c0_32, %c0_33] : memref<1x8x8xf32, #tpu.memory_space<vmem>>, vector<1x8x8xf32>
    tpu.vector_store %arg10[%c0_31, %c0_32, %c0_33], %74 {strides = array<i32>} : memref<1x8x8xf32, #tpu.memory_space<vmem>>, vector<1x8x8xf32>,
    %76 = vector.extract_strided_slice %7 {offsets = [0, 16], sizes = [8, 8], strides = [1, 1]} : vector<8x96xf32> to vector<8x8xf32>
    %77 = vector.shape_cast %76 : vector<8x8xf32> to vector<1x8x8xf32>
    %78 = arith.truncf %77 : vector<1x8x8xf32> to vector<1x8x8xbf16>
    %79 = vector.extract_strided_slice %7 {offsets = [0, 48], sizes = [8, 8], strides = [1, 1]} : vector<8x96xf32> to vector<8x8xf32>
    %80 = vector.shape_cast %79 : vector<8x8xf32> to vector<1x8x8xf32>
    %81 = arith.truncf %80 : vector<1x8x8xf32> to vector<1x8x8xbf16>
    %82 = vector.extract_strided_slice %7 {offsets = [0, 80], sizes = [8, 8], strides = [1, 1]} : vector<8x96xf32> to vector<8x8xf32>
    %83 = vector.shape_cast %82 : vector<8x8xf32> to vector<1x8x8xf32>
    %84 = arith.truncf %83 : vector<1x8x8xf32> to vector<1x8x8xbf16>
    "tpu.trace_start"() <{level = 10 : i32, message = "bqd,bkd->bqk"}> : () -> ()
    %cst_34 = arith.constant dense<0.000000e+00> : vector<1x8x8xf32>
    %85 = tpu.matmul %78, %81, %cst_34 {dimension_numbers = #tpu.dot_dimension_numbers<[2], [2], [1], [1], [0, 0, 0, 1, 1, 1], [0], [0]>} : vector<1x8x8xbf16>, vector<1x8x8xbf16>, vector<1x8x8xf32> -> vector<1x8x8xf32>
    "tpu.trace_stop"() : () -> ()
    %86 = vector.broadcast %13 : vector<1x1x8xf32> to vector<1x8x8xf32>
    %87 = arith.addf %85, %86 : vector<1x8x8xf32>
    %cst_35 = arith.constant dense<0xFF800000> : vector<1x8xf32>
    %88 = vector.multi_reduction <maximumf>, %87, %cst_35 [2] : vector<1x8x8xf32> to vector<1x8xf32>
    %89 = vector.shape_cast %88 : vector<1x8xf32> to vector<1x8x1xf32>
    %90 = vector.broadcast %89 : vector<1x8x1xf32> to vector<1x8x8xf32>
    %91 = arith.subf %87, %90 : vector<1x8x8xf32>
    %92 = math.exp %91 : vector<1x8x8xf32>
    %cst_36 = arith.constant dense<0.000000e+00> : vector<1x8xf32>
    %93 = vector.multi_reduction <add>, %92, %cst_36 [2] : vector<1x8x8xf32> to vector<1x8xf32>
    %94 = vector.shape_cast %93 : vector<1x8xf32> to vector<1x8x1xf32>
    %95 = tpu.reciprocal %94 {approx = true} : vector<1x8x1xf32> -> vector<1x8x1xf32>
    %96 = vector.broadcast %95 : vector<1x8x1xf32> to vector<1x8x8xf32>
    %97 = arith.mulf %92, %96 : vector<1x8x8xf32>
    %98 = arith.truncf %97 : vector<1x8x8xf32> to vector<1x8x8xbf16>
    "tpu.trace_start"() <{level = 10 : i32, message = "bqk,bkd->bqd"}> : () -> ()
    %cst_37 = arith.constant dense<0.000000e+00> : vector<1x8x8xf32>
    %99 = tpu.matmul %98, %84, %cst_37 {dimension_numbers = #tpu.dot_dimension_numbers<[2], [1], [1], [2], [0, 0, 0, 1, 1, 2], [0], [0]>} : vector<1x8x8xbf16>, vector<1x8x8xbf16>, vector<1x8x8xf32> -> vector<1x8x8xf32>
    "tpu.trace_stop"() : () -> ()
    %100 = vector.shape_cast %99 : vector<1x8x8xf32> to vector<8x8xf32>
    %101 = arith.truncf %100 : vector<8x8xf32> to vector<8x8xbf16>
    %c0_38 = arith.constant 0 : index
    %c16 = arith.constant 16 : index
    %102 = vector.load %arg11[%c0_38, %c16] : memref<8x32xbf16, #tpu.memory_space<vmem>>, vector<8x8xbf16>
    tpu.vector_store %arg11[%c0_38, %c16], %101 {strides = array<i32>} : memref<8x32xbf16, #tpu.memory_space<vmem>>, vector<8x8xbf16>,
    %c0_39 = arith.constant 0 : index
    %c0_40 = arith.constant 0 : index
    %c0_41 = arith.constant 0 : index
    %103 = vector.load %arg10[%c0_39, %c0_40, %c0_41] : memref<1x8x8xf32, #tpu.memory_space<vmem>>, vector<1x8x8xf32>
    %cst_42 = arith.constant 2.500000e-01 : f32
    %104 = vector.broadcast %cst_42 : f32 to vector<1x8x8xf32>
    %105 = arith.mulf %97, %104 : vector<1x8x8xf32>
    %106 = arith.addf %103, %105 : vector<1x8x8xf32>
    %c0_43 = arith.constant 0 : index
    %c0_44 = arith.constant 0 : index
    %c0_45 = arith.constant 0 : index
    %107 = vector.load %arg10[%c0_43, %c0_44, %c0_45] : memref<1x8x8xf32, #tpu.memory_space<vmem>>, vector<1x8x8xf32>
    tpu.vector_store %arg10[%c0_43, %c0_44, %c0_45], %106 {strides = array<i32>} : memref<1x8x8xf32, #tpu.memory_space<vmem>>, vector<1x8x8xf32>,
    %108 = vector.extract_strided_slice %7 {offsets = [0, 24], sizes = [8, 8], strides = [1, 1]} : vector<8x96xf32> to vector<8x8xf32>
    %109 = vector.shape_cast %108 : vector<8x8xf32> to vector<1x8x8xf32>
    %110 = arith.truncf %109 : vector<1x8x8xf32> to vector<1x8x8xbf16>
    %111 = vector.extract_strided_slice %7 {offsets = [0, 56], sizes = [8, 8], strides = [1, 1]} : vector<8x96xf32> to vector<8x8xf32>
    %112 = vector.shape_cast %111 : vector<8x8xf32> to vector<1x8x8xf32>
    %113 = arith.truncf %112 : vector<1x8x8xf32> to vector<1x8x8xbf16>
    %114 = vector.extract_strided_slice %7 {offsets = [0, 88], sizes = [8, 8], strides = [1, 1]} : vector<8x96xf32> to vector<8x8xf32>
    %115 = vector.shape_cast %114 : vector<8x8xf32> to vector<1x8x8xf32>
    %116 = arith.truncf %115 : vector<1x8x8xf32> to vector<1x8x8xbf16>
    "tpu.trace_start"() <{level = 10 : i32, message = "bqd,bkd->bqk"}> : () -> ()
    %cst_46 = arith.constant dense<0.000000e+00> : vector<1x8x8xf32>
    %117 = tpu.matmul %110, %113, %cst_46 {dimension_numbers = #tpu.dot_dimension_numbers<[2], [2], [1], [1], [0, 0, 0, 1, 1, 1], [0], [0]>} : vector<1x8x8xbf16>, vector<1x8x8xbf16>, vector<1x8x8xf32> -> vector<1x8x8xf32>
    "tpu.trace_stop"() : () -> ()
    %118 = vector.broadcast %13 : vector<1x1x8xf32> to vector<1x8x8xf32>
    %119 = arith.addf %117, %118 : vector<1x8x8xf32>
    %cst_47 = arith.constant dense<0xFF800000> : vector<1x8xf32>
    %120 = vector.multi_reduction <maximumf>, %119, %cst_47 [2] : vector<1x8x8xf32> to vector<1x8xf32>
    %121 = vector.shape_cast %120 : vector<1x8xf32> to vector<1x8x1xf32>
    %122 = vector.broadcast %121 : vector<1x8x1xf32> to vector<1x8x8xf32>
    %123 = arith.subf %119, %122 : vector<1x8x8xf32>
    %124 = math.exp %123 : vector<1x8x8xf32>
    %cst_48 = arith.constant dense<0.000000e+00> : vector<1x8xf32>
    %125 = vector.multi_reduction <add>, %124, %cst_48 [2] : vector<1x8x8xf32> to vector<1x8xf32>
    %126 = vector.shape_cast %125 : vector<1x8xf32> to vector<1x8x1xf32>
    %127 = tpu.reciprocal %126 {approx = true} : vector<1x8x1xf32> -> vector<1x8x1xf32>
    %128 = vector.broadcast %127 : vector<1x8x1xf32> to vector<1x8x8xf32>
    %129 = arith.mulf %124, %128 : vector<1x8x8xf32>
    %130 = arith.truncf %129 : vector<1x8x8xf32> to vector<1x8x8xbf16>
    "tpu.trace_start"() <{level = 10 : i32, message = "bqk,bkd->bqd"}> : () -> ()
    %cst_49 = arith.constant dense<0.000000e+00> : vector<1x8x8xf32>
    %131 = tpu.matmul %130, %116, %cst_49 {dimension_numbers = #tpu.dot_dimension_numbers<[2], [1], [1], [2], [0, 0, 0, 1, 1, 2], [0], [0]>} : vector<1x8x8xbf16>, vector<1x8x8xbf16>, vector<1x8x8xf32> -> vector<1x8x8xf32>
    "tpu.trace_stop"() : () -> ()
    %132 = vector.shape_cast %131 : vector<1x8x8xf32> to vector<8x8xf32>
    %133 = arith.truncf %132 : vector<8x8xf32> to vector<8x8xbf16>
    %c0_50 = arith.constant 0 : index
    %c24 = arith.constant 24 : index
    %134 = vector.load %arg11[%c0_50, %c24] : memref<8x32xbf16, #tpu.memory_space<vmem>>, vector<8x8xbf16>
    tpu.vector_store %arg11[%c0_50, %c24], %133 {strides = array<i32>} : memref<8x32xbf16, #tpu.memory_space<vmem>>, vector<8x8xbf16>,
    %c0_51 = arith.constant 0 : index
    %c0_52 = arith.constant 0 : index
    %c0_53 = arith.constant 0 : index
    %135 = vector.load %arg10[%c0_51, %c0_52, %c0_53] : memref<1x8x8xf32, #tpu.memory_space<vmem>>, vector<1x8x8xf32>
    %cst_54 = arith.constant 2.500000e-01 : f32
    %136 = vector.broadcast %cst_54 : f32 to vector<1x8x8xf32>
    %137 = arith.mulf %129, %136 : vector<1x8x8xf32>
    %138 = arith.addf %135, %137 : vector<1x8x8xf32>
    %c0_55 = arith.constant 0 : index
    %c0_56 = arith.constant 0 : index
    %c0_57 = arith.constant 0 : index
    %139 = vector.load %arg10[%c0_55, %c0_56, %c0_57] : memref<1x8x8xf32, #tpu.memory_space<vmem>>, vector<1x8x8xf32>
    tpu.vector_store %arg10[%c0_55, %c0_56, %c0_57], %138 {strides = array<i32>} : memref<1x8x8xf32, #tpu.memory_space<vmem>>, vector<1x8x8xf32>,
    %c0_58 = arith.constant 0 : index
    %c0_59 = arith.constant 0 : index
    %140 = vector.load %arg11[%c0_58, %c0_59] : memref<8x32xbf16, #tpu.memory_space<vmem>>, vector<8x32xbf16>
    %c0_60 = arith.constant 0 : index
    %c0_61 = arith.constant 0 : index
    %141 = vector.load %arg5[%c0_60, %c0_61] : memref<32x32xbf16, #tpu.memory_space<vmem>>, vector<32x32xbf16>
    %cst_62 = arith.constant dense<0.000000e+00> : vector<8x32xf32>
    %142 = tpu.matmul %140, %141, %cst_62 {dimension_numbers = #tpu.dot_dimension_numbers<[1], [0], [0], [1], [0, 0, 1, 1], [], []>} : vector<8x32xbf16>, vector<32x32xbf16>, vector<8x32xf32> -> vector<8x32xf32>
    %c0_63 = arith.constant 0 : index
    %c0_64 = arith.constant 0 : index
    %143 = vector.load %arg6[%c0_63, %c0_64] : memref<1x32xf32, #tpu.memory_space<vmem>>, vector<1x32xf32>
    %144 = vector.broadcast %143 : vector<1x32xf32> to vector<8x32xf32>
    %145 = arith.addf %142, %144 : vector<8x32xf32>
    %146 = arith.addf %1, %145 : vector<8x32xf32>
    %cst_65 = arith.constant dense<0.000000e+00> : vector<8xf32>
    %147 = vector.multi_reduction <add>, %146, %cst_65 [1] : vector<8x32xf32> to vector<8xf32>
    %148 = vector.shape_cast %147 : vector<8xf32> to vector<8x1xf32>
    %cst_66 = arith.constant 3.200000e+01 : f32
    %149 = vector.broadcast %cst_66 : f32 to vector<8x1xf32>
    %150 = arith.divf %148, %149 : vector<8x1xf32>
    %151 = vector.broadcast %150 : vector<8x1xf32> to vector<8x32xf32>
    %152 = arith.subf %146, %151 : vector<8x32xf32>
    %153 = vector.broadcast %150 : vector<8x1xf32> to vector<8x32xf32>
    %154 = arith.subf %146, %153 : vector<8x32xf32>
    %155 = arith.mulf %152, %154 : vector<8x32xf32>
    %cst_67 = arith.constant dense<0.000000e+00> : vector<8xf32>
    %156 = vector.multi_reduction <add>, %155, %cst_67 [1] : vector<8x32xf32> to vector<8xf32>
    %157 = vector.shape_cast %156 : vector<8xf32> to vector<8x1xf32>
    %cst_68 = arith.constant 3.200000e+01 : f32
    %158 = vector.broadcast %cst_68 : f32 to vector<8x1xf32>
    %159 = arith.divf %157, %158 : vector<8x1xf32>
    %160 = vector.broadcast %150 : vector<8x1xf32> to vector<8x32xf32>
    %161 = arith.subf %146, %160 : vector<8x32xf32>
    %cst_69 = arith.constant 9.99999974E-6 : f32
    %162 = vector.broadcast %cst_69 : f32 to vector<8x1xf32>
    %163 = arith.addf %159, %162 : vector<8x1xf32>
    %164 = math.rsqrt %163 : vector<8x1xf32>
    %165 = vector.broadcast %164 : vector<8x1xf32> to vector<8x32xf32>
    %166 = arith.mulf %161, %165 : vector<8x32xf32>
    %c0_70 = arith.constant 0 : index
    %c0_71 = arith.constant 0 : index
    %167 = vector.load %arg7[%c0_70, %c0_71] : memref<1x32xf32, #tpu.memory_space<vmem>>, vector<1x32xf32>
    %168 = vector.broadcast %167 : vector<1x32xf32> to vector<8x32xf32>
    %169 = arith.mulf %166, %168 : vector<8x32xf32>
    %c0_72 = arith.constant 0 : index
    %c0_73 = arith.constant 0 : index
    %170 = vector.load %arg8[%c0_72, %c0_73] : memref<1x32xf32, #tpu.memory_space<vmem>>, vector<1x32xf32>
    %171 = vector.broadcast %170 : vector<1x32xf32> to vector<8x32xf32>
    %172 = arith.addf %169, %171 : vector<8x32xf32>
    %173 = vector.shape_cast %172 : vector<8x32xf32> to vector<1x8x32xf32>
    %c0_74 = arith.constant 0 : index
    %c0_75 = arith.constant 0 : index
    %c0_76 = arith.constant 0 : index
    %174 = vector.load %arg9[%c0_74, %c0_75, %c0_76] : memref<1x8x32xf32, #tpu.memory_space<vmem>>, vector<1x8x32xf32>
    tpu.vector_store %arg9[%c0_74, %c0_75, %c0_76], %173 {strides = array<i32>} : memref<1x8x32xf32, #tpu.memory_space<vmem>>, vector<1x8x32xf32>,
    return
  }
  func.func @transform_0(%arg0: i32) -> (i32, i32, i32) {
    %c0_i32 = arith.constant 0 : i32
    %c0_i32_0 = arith.constant 0 : i32
    %c0_i32_1 = arith.constant 0 : i32
    return %arg0, %c0_i32, %c0_i32_0 : i32, i32, i32
  }
  func.func @transform_1(%arg0: i32) -> (i32, i32, i32) {
    %c0_i32 = arith.constant 0 : i32
    %c0_i32_0 = arith.constant 0 : i32
    %c0_i32_1 = arith.constant 0 : i32
    return %arg0, %c0_i32, %c0_i32_0 : i32, i32, i32
  }
  func.func @transform_2(%arg0: i32) -> (i32, i32) {
    %c0_i32 = arith.constant 0 : i32
    %c0_i32_0 = arith.constant 0 : i32
    %c0_i32_1 = arith.constant 0 : i32
    return %c0_i32, %c0_i32_0 : i32, i32
  }
  func.func @transform_3(%arg0: i32) -> (i32, i32) {
    %c0_i32 = arith.constant 0 : i32
    %c0_i32_0 = arith.constant 0 : i32
    %c0_i32_1 = arith.constant 0 : i32
    return %c0_i32, %c0_i32_0 : i32, i32
  }
  func.func @transform_4(%arg0: i32) -> (i32, i32) {
    %c0_i32 = arith.constant 0 : i32
    %c0_i32_0 = arith.constant 0 : i32
    %c0_i32_1 = arith.constant 0 : i32
    return %c0_i32, %c0_i32_0 : i32, i32
  }
  func.func @transform_5(%arg0: i32) -> (i32, i32) {
    %c0_i32 = arith.constant 0 : i32
    %c0_i32_0 = arith.constant 0 : i32
    %c0_i32_1 = arith.constant 0 : i32
    return %c0_i32, %c0_i32_0 : i32, i32
  }
  func.func @transform_6(%arg0: i32) -> (i32, i32) {
    %c0_i32 = arith.constant 0 : i32
    %c0_i32_0 = arith.constant 0 : i32
    %c0_i32_1 = arith.constant 0 : i32
    return %c0_i32, %c0_i32_0 : i32, i32
  }
  func.func @transform_7(%arg0: i32) -> (i32, i32) {
    %c0_i32 = arith.constant 0 : i32
    %c0_i32_0 = arith.constant 0 : i32
    %c0_i32_1 = arith.constant 0 : i32
    return %c0_i32, %c0_i32_0 : i32, i32
  }
  func.func @transform_8(%arg0: i32) -> (i32, i32, i32) {
    %c0_i32 = arith.constant 0 : i32
    %c0_i32_0 = arith.constant 0 : i32
    %c0_i32_1 = arith.constant 0 : i32
    return %arg0, %c0_i32, %c0_i32_0 : i32, i32, i32
  }
  func.func @transform_9(%arg0: i32) -> (i32, i32, i32) {
    %c0_i32 = arith.constant 0 : i32
    %c0_i32_0 = arith.constant 0 : i32
    %c0_i32_1 = arith.constant 0 : i32
    return %arg0, %c0_i32, %c0_i32_0 : i32, i32, i32
  }
}

</mosaic_0001>

<bundles_post_ra>
// kernel: tpu_custom_call.1
= control target key start
LH: loop header
LB: loop body
LE: loop exit
PB: predicated region body
PF: predicated region fallthrough
CT: control target
= control target key end

     0   :  { %s2569_s0 = inlined_call_operand.hbm [shape: f32[2,8,32], index: 0, kind: input, shape index: {}]   ;;  %s2570_s1 = inlined_call_operand.hbm [shape: f32[2,1,8], index: 1, kind: input, shape index: {}]   ;;  %s2571_s2 = inlined_call_operand.hbm [shape: bf16[32,96], index: 2, kind: input, shape index: {}]   ;;  %s2572_s3 = inlined_call_operand.hbm [shape: f32[1,96], index: 3, kind: input, shape index: {}]   ;;  %s2573_s4 = inlined_call_operand.hbm [shape: bf16[32,32], index: 4, kind: input, shape index: {}]   ;;  %s2574_s5 = inlined_call_operand.hbm [shape: f32[1,32], index: 5, kind: input, shape index: {}]   ;;  %s2575_s6 = inlined_call_operand.hbm [shape: f32[1,32], index: 6, kind: input, shape index: {}]   ;;  %s2576_s7 = inlined_call_operand.hbm [shape: f32[1,32], index: 7, kind: input, shape index: {}]   ;;  %s2577_s8 = inlined_call_operand.hbm [shape: f32[2,8,32], index: 8, kind: output, shape index: {0}]   ;;  %s2578_s9 = inlined_call_operand.hbm [shape: f32[2,8,8], index: 9, kind: output, shape index: {1}]  }
   0x1   :  { %2585 = sst [smem:[#allocation28_spill]] %s2569_s0 }
   0x2   :  { %2586 = sst [smem:[#allocation29_spill]] %s2571_s2 }
   0x3   :  { %2587 = sst [smem:[#allocation30_spill]] %s2572_s3 }
   0x4   :  { %2588 = sst [smem:[#allocation31_spill]] %s2577_s8 }
   0x5   :  { %15 = vsyncpa [#allocation4], 0 }
   0x6   :  { %17 = vsyncpa [#allocation4 + $0x1], 0 }
   0x7   :  { %18 = vsyncpa [#allocation7], 0 }
   0x8   :  { %20 = vsyncpa [#allocation7 + $0x1], 0 }
   0x9   :  { %21 = vsyncpa [#allocation10], 0 }
   0xa   :  { %22 = vsyncpa [#allocation13], 0 }
   0xb   :  { %23 = vsyncpa [#allocation16], 0 }
   0xc   :  { %24 = vsyncpa [#allocation5], 0 }
   0xd   :  { %26 = vsyncpa [#allocation5 + $0x1], 0 }
   0xe   :  { %27 = vsyncpa [#allocation19], 0 }
   0xf   :  { %29 = vsyncpa [#allocation19 + $0x1], 0  ;;  %s2070_s30 = smov 0   ;;  %s2072_s10 = smov 0  }
  0x10   :  { %s2074_s11 = smov 0   ;;  %s2076_s12 = smov 0  }
  0x11 LB: > { %s1991_s13 = smov [#allocation8]   ;;  %s2091_s15 = sadd.s32 4294967295, %s1989_s12   ;;  %s1989_s12 = sphi %s2076_s12, %s2620_s12   ;;  %s1985_s11 = sphi %s2074_s11, %s2619_s11   ;;  %s1981_s10 = sphi %s2072_s10, %s2618_s10   ;;  %s1977_s30 = sphi %s2070_s30, %s2617_s30  }
  0x12   : > { %s282_s14 = sshll.u32 %s1991_s13, 4  ;;  %p1348_p0 = scmp.ge.s32.totalorder %s1989_s12, 1  ;;  %s2096_s14 = int_to_ptr.vmem [resolvable:$true] %s282_s14 }
  0x13   : > { %p2581_p1 = scmp.eq.s32.totalorder %s2091_s15, 0  ;;  %p270_p2 = scmp.lt.s32.totalorder %s1989_s12, 3 }
  0x14   : > { %s1992_s17 = smov [#allocation9]   ;;  %s1993_s20 = smov [#allocation12]  }
  0x15   : > { %p2098_p3 = pnand %p1348_p0, %p270_p2  ;;  %s296_s18 = sshll.u32 %s1992_s17, 4  ;;  %s2111_s18 = int_to_ptr.vmem [resolvable:$true] %s296_s18 }
  0x16   : > { %s320_s21 = sshll.u32 %s1993_s20, 4  ;;  %s2591_s2 = sld [smem:[#allocation29_spill]]  ;;  %s2113_s21 = int_to_ptr.vmem [resolvable:$true] %s320_s21 }
  0x17   : > { %s2589_s16 = scalar_select %p2098_p3, 1, 0 }
  0x18   : > { %p1517_p5 = pneg %p2098_p3 }
  0x1a   : > { %p2107_p6 = pnand %p1517_p5, %p2581_p1 }
  0x1c   : > { %s1643_s24 = scalar_lea.hbm %s2591_s2, 256  ;;  %p2123_p8 = pneg %p2107_p6 }
  0x1d   : > { %p1644_p7 = scmp.ne.s32.totalorder %s2591_s2, %s1643_s24  ;;  %p1650_p11 = scmp.lt.u32.totalorder %s1643_s24, %s2591_s2 }
  0x1f   : > { %p1646_p9 = pnand %p2123_p8, %p1644_p7 }
  0x21   : > { %p1647_p10 = pneg %p1646_p9 }
  0x23   : > { %p1652_p12 = pnand %p1650_p11, %p1647_p10 }
  0x25   : > { %1655 = shalt.err (!%p1652_p12)
}
  0x26   : > { %s1656_s13 = scalar_lea.vmem %s2096_s14, 256  ;;  %p1664_p5 = scmp.lt.s32.totalorder %s2096_s14, %s2096_s14 }
  0x27   : > { %p1657_p13 = scmp.ne.s32.totalorder %s2096_s14, %s1656_s13  ;;  %p1665_p4 = scmp.lt.s32.totalorder %s1656_s13, %s1656_s13 }
  0x29   : > { %p1659_p0 = pnand %p1657_p13, %p2123_p8  ;;  %p1666_p7 = por %p1665_p4, %p1664_p5 }
  0x2b   : > { %p1660_p2 = pneg %p1659_p0 }
  0x2d   : > { %p1667_p9 = pnand %p1666_p7, %p1660_p2 }
  0x2f   : > { %1670 = shalt.err (!%p1667_p9)
}
  0x30   : > { %s2580_s17 = smov 64   ;;  %s1995_s20 = smov 4  }
  0x31   : > { %1520 = dma.hbm_to_vmem [thread:$0]  (!%p2107_p6), %s2591_s2, 256, %s2096_s14, [#allocation7], %s2580_s17, %s2580_s17, %s1995_s20  }
  0x32   : > { %s2593_s3 = sld [smem:[#allocation30_spill]] }
  0x38   : > { %s1671_s26 = scalar_lea.hbm %s2593_s3, 16 }
  0x39   : > { %p1672_p4 = scmp.ne.s32.totalorder %s2593_s3, %s1671_s26  ;;  %p1678_p12 = scmp.lt.u32.totalorder %s1671_s26, %s2593_s3 }
  0x3b   : > { %p1674_p10 = pnand %p1672_p4, %p2123_p8 }
  0x3d   : > { %p1675_p11 = pneg %p1674_p10 }
  0x3f   : > { %p1680_p13 = pnand %p1678_p12, %p1675_p11 }
  0x41   : > { %1683 = shalt.err (!%p1680_p13)
}
  0x42   : > { %s1684_s14 = scalar_lea.vmem %s2111_s18, 16  ;;  %s1691_s22 = scalar_lea.vmem %s2111_s18, 32 }
  0x43   : > { %p1685_p0 = scmp.ne.s32.totalorder %s2111_s18, %s1684_s14  ;;  %p1692_p7 = scmp.lt.s32.totalorder %s2111_s18, %s2111_s18 }
  0x44   : > { %p1693_p9 = scmp.lt.s32.totalorder %s1691_s22, %s1684_s14 }
  0x45   : > { %p1687_p2 = pnand %p1685_p0, %p2123_p8 }
  0x46   : > { %p1694_p4 = por %p1693_p9, %p1692_p7 }
  0x47   : > { %p1688_p5 = pneg %p1687_p2 }
  0x49   : > { %p1695_p10 = pnand %p1694_p4, %p1688_p5 }
  0x4b   : > { %1698 = shalt.err (!%p1695_p10)
}
  0x4c   : > { %1523 = dma.hbm_to_vmem [thread:$0]  (!%p2107_p6), %s2593_s3, 16, %s2111_s18, [#allocation10]  }
  0x4d   : > { %s1699_s26 = scalar_lea.hbm %s2574_s5, 16 }
  0x4e   : > { %p1700_p11 = scmp.ne.s32.totalorder %s2574_s5, %s1699_s26  ;;  %p1706_p0 = scmp.lt.u32.totalorder %s1699_s26, %s2574_s5 }
  0x50   : > { %p1702_p12 = pnand %p1700_p11, %p2123_p8 }
  0x52   : > { %p1703_p13 = pneg %p1702_p12 }
  0x54   : > { %p1708_p2 = pnand %p1706_p0, %p1703_p13 }
  0x56   : > { %1711 = shalt.err (!%p1708_p2)
}
  0x57   : > { %s1712_s18 = scalar_lea.vmem %s2113_s21, 16  ;;  %s1719_s22 = scalar_lea.vmem %s2113_s21, 32 }
  0x58   : > { %p1713_p5 = scmp.ne.s32.totalorder %s2113_s21, %s1712_s18  ;;  %p1720_p4 = scmp.lt.s32.totalorder %s2113_s21, %s2113_s21 }
  0x59   : > { %p1721_p10 = scmp.lt.s32.totalorder %s1719_s22, %s1712_s18 }
  0x5a   : > { %p1715_p7 = pnand %p1713_p5, %p2123_p8 }
  0x5b   : > { %p1722_p11 = por %p1721_p10, %p1720_p4 }
  0x5c   : > { %p1716_p9 = pneg %p1715_p7 }
  0x5e   : > { %p1723_p12 = pnand %p1722_p11, %p1716_p9 }
  0x60   : > { %1726 = shalt.err (!%p1723_p12)
}
  0x61   : > { %1529 = dma.hbm_to_vmem [thread:$0]  (!%p2107_p6), %s2574_s5, 16, %s2113_s21, [#allocation13]  }
  0x62   : > { %s1996_s24 = smov [#allocation11]   ;;  %s1997_s26 = smov [#allocation14]  }
  0x63   : > { %s306_s25 = sshll.u32 %s1996_s24, 4  ;;  %s331_s28 = sshll.u32 %s1997_s26, 4  ;;  %s307_s25 = int_to_ptr.vmem [resolvable:$true] %s306_s25  ;;  %s332_s28 = int_to_ptr.vmem [resolvable:$true] %s331_s28 }
  0x64   : > { %s1727_s14 = scalar_lea.hbm %s2573_s4, 256 }
  0x65   : > { %p1728_p13 = scmp.ne.s32.totalorder %s2573_s4, %s1727_s14  ;;  %p1734_p5 = scmp.lt.u32.totalorder %s1727_s14, %s2573_s4 }
  0x67   : > { %p1730_p0 = pnand %p1728_p13, %p2123_p8 }
  0x69   : > { %p1731_p2 = pneg %p1730_p0 }
  0x6b   : > { %p1736_p7 = pnand %p1734_p5, %p1731_p2 }
  0x6d   : > { %1739 = shalt.err (!%p1736_p7)
}
  0x6e   : > { %s1740_s21 = scalar_lea.vmem %s307_s25, 256  ;;  %p1748_p11 = scmp.lt.s32.totalorder %s307_s25, %s307_s25 }
  0x6f   : > { %p1741_p9 = scmp.ne.s32.totalorder %s307_s25, %s1740_s21  ;;  %p1749_p12 = scmp.lt.s32.totalorder %s1740_s21, %s1740_s21 }
  0x71   : > { %p1743_p4 = pnand %p1741_p9, %p2123_p8  ;;  %p1750_p1 = por %p1749_p12, %p1748_p11 }
  0x73   : > { %p1744_p10 = pneg %p1743_p4 }
  0x75   : > { %p1751_p3 = pnand %p1750_p1, %p1744_p10 }
  0x77   : > { %1754 = shalt.err (!%p1751_p3)
}
  0x78   : > { %s2594_s23 = smov 64   ;;  %s1755_s13 = scalar_lea.hbm %s2575_s6, 16 }
  0x79   : > { %1526 = dma.hbm_to_vmem [thread:$0]  (!%p2107_p6), %s2573_s4, 256, %s307_s25, [#allocation10], %s2594_s23, %s2594_s23, %s1995_s20  }
  0x7a   : > { %p1756_p1 = scmp.ne.s32.totalorder %s2575_s6, %s1755_s13  ;;  %p1762_p0 = scmp.lt.u32.totalorder %s1755_s13, %s2575_s6 }
  0x7c   : > { %p1758_p3 = pnand %p1756_p1, %p2123_p8 }
  0x7e   : > { %p1759_p13 = pneg %p1758_p3 }
  0x80   : > { %p1764_p2 = pnand %p1762_p0, %p1759_p13 }
  0x82   : > { %1767 = shalt.err (!%p1764_p2)
}
  0x83   : > { %s1768_s21 = scalar_lea.vmem %s332_s28, 16  ;;  %s1775_s20 = scalar_lea.vmem %s332_s28, 32 }
  0x84   : > { %p1769_p5 = scmp.ne.s32.totalorder %s332_s28, %s1768_s21  ;;  %p1776_p4 = scmp.lt.s32.totalorder %s332_s28, %s332_s28 }
  0x85   : > { %p1777_p10 = scmp.lt.s32.totalorder %s1775_s20, %s1768_s21 }
  0x86   : > { %p1771_p7 = pnand %p1769_p5, %p2123_p8 }
  0x87   : > { %p1778_p11 = por %p1777_p10, %p1776_p4 }
  0x88   : > { %p1772_p9 = pneg %p1771_p7 }
  0x8a   : > { %p1779_p12 = pnand %p1778_p11, %p1772_p9 }
  0x8c   : > { %1782 = shalt.err (!%p1779_p12)
}
  0x8d   : > { %1532 = dma.hbm_to_vmem [thread:$0]  (!%p2107_p6), %s2575_s6, 16, %s332_s28, [#allocation13]  }
  0x8e   : > { %s1998_s17 = smov [#allocation15]   ;;  %s1783_s13 = scalar_lea.hbm %s2576_s7, 16 }
  0x8f   : > { %s342_s24 = sshll.u32 %s1998_s17, 4  ;;  %p1784_p1 = scmp.ne.s32.totalorder %s2576_s7, %s1783_s13  ;;  %s343_s24 = int_to_ptr.vmem [resolvable:$true] %s342_s24 }
  0x90   : > { %p1790_p0 = scmp.lt.u32.totalorder %s1783_s13, %s2576_s7 }
  0x91   : > { %p1786_p3 = pnand %p1784_p1, %p2123_p8 }
  0x93   : > { %p1787_p13 = pneg %p1786_p3 }
  0x95   : > { %p1792_p2 = pnand %p1790_p0, %p1787_p13 }
  0x97   : > { %1795 = shalt.err (!%p1792_p2)
}
  0x98   : > { %s1796_s28 = scalar_lea.vmem %s343_s24, 16  ;;  %s1803_s21 = scalar_lea.vmem %s343_s24, 32 }
  0x99   : > { %p1797_p5 = scmp.ne.s32.totalorder %s343_s24, %s1796_s28  ;;  %p1804_p4 = scmp.lt.s32.totalorder %s343_s24, %s343_s24 }
  0x9a   : > { %p1805_p10 = scmp.lt.s32.totalorder %s1803_s21, %s1796_s28 }
  0x9b   : > { %p1799_p7 = pnand %p1797_p5, %p2123_p8 }
  0x9c   : > { %p1806_p11 = por %p1805_p10, %p1804_p4 }
  0x9d   : > { %p1800_p9 = pneg %p1799_p7 }
  0x9f   : > { %p1807_p12 = pnand %p1806_p11, %p1800_p9 }
  0xa1   : > { %1810 = shalt.err (!%p1807_p12)
}
  0xa2   : > { %1535 = dma.hbm_to_vmem [thread:$0]  (!%p2107_p6), %s2576_s7, 16, %s343_s24, [#allocation16]  }
  0xa3   : > { %s1347_s27 = sadd.s32 4294967294, %s1989_s12   ;;  %s2254_s19 = sadd.s32 1, %s1989_s12  }
  0xa4   : > { %s39_s23 = ssub.s32 %s1989_s12, %s2254_s19  ;;  %s42_s17 = sadd.s32 1, %s1985_s11 }
  0xa5   : > { %p40_p8 = scmp.eq.s32.totalorder %s39_s23, 0  ;;  %p49_p1 = scmp.ne.s32.totalorder %s1985_s11, %s1981_s10 }
  0xa6   : > { %p50_p3 = scmp.eq.s32.totalorder %s1989_s12, 0  ;;  %p55_p13 = scmp.ne.s32.totalorder %s1981_s10, %s1977_s30 }
  0xa7   : > { %s2265_s26 = scalar_select %p40_p8, %s1985_s11, %s42_s17  }
  0xa8   : > { %p2267_p0 = por %p50_p3, %p49_p1  ;;  %p2596_p2 = scmp.eq.s32.totalorder %s2091_s15, 0 }
  0xa9   : > { %p231_p5 = scmp.eq.s32.totalorder %s2091_s15, 1  ;;  %p237_p7 = scmp.eq.s32.totalorder %s1347_s27, 1 }
  0xaa   : > { %p2273_p6 = por %p2596_p2, %p55_p13  ;;  %p1556_p9 = scmp.lt.s32.totalorder %s1989_s12, 2 }
  0xab   : > { %s2280_s13 = sand.u32 1, %s1985_s11   ;;  %p2282_p4 = por %p231_p5, %p49_p1 }
  0xac   : > { %s2597_s24 = scalar_select %p2273_p6, 1, 0 }
  0xad   : > { %s2598_s14 = scalar_select %p2282_p4, 1, 0 }
  0xae   : > { %p2286_p10 = por %p237_p7, %p55_p13  ;;  %s1356_s22 = sshll.u32 %s2280_s13, 3 }
  0xaf   : > { %s1357_s8 = sshll.u32 %s1989_s12, 7  ;;  %s2600_s0 = sld [smem:[#allocation28_spill]] }
  0xb0   : > { %s2599_s18 = scalar_select %p2286_p10, 1, 0 }
  0xb1   : > { %s357_s25 = scalar_lea.vmem [#allocation3], %s1356_s22  ;;  %p2301_p11 = pnand %p1556_p9, %p2267_p0 }
  0xb2   : > { %s364_s27 = sshll.u32 %s357_s25, 4  ;;  %s354_s2 = scalar_lea.sflag [#allocation4], %s2280_s13  ;;  %s2297_s27 = int_to_ptr.vmem [resolvable:$true] %s364_s27 }
  0xb3   : > { %p1813_p8 = pneg %p2301_p11 }
  0xb5   : > { %s2295_s20 = scalar_lea.hbm %s2600_s0, %s1357_s8  ;;  %s1816_s29 = scalar_lea.hbm %s2600_s0, 256 }
  0xb6   : > { %s1811_s28 = scalar_lea.hbm %s2295_s20, 128  ;;  %p1817_p13 = scmp.lt.u32.totalorder %s2295_s20, %s2600_s0 }
  0xb7   : > { %p1812_p12 = scmp.ne.s32.totalorder %s2295_s20, %s1811_s28  ;;  %p1818_p0 = scmp.lt.u32.totalorder %s1816_s29, %s1811_s28 }
  0xb8   : > { %p1820_p5 = scmp.lt.u32.totalorder %s1811_s28, %s2295_s20 }
  0xb9   : > { %p1814_p1 = pnand %p1813_p8, %p1812_p12  ;;  %p1819_p2 = por %p1818_p0, %p1817_p13 }
  0xbb   : > { %p1815_p3 = pneg %p1814_p1  ;;  %p1821_p7 = por %p1820_p5, %p1819_p2 }
  0xbd   : > { %p1822_p9 = pnand %p1821_p7, %p1815_p3 }
  0xbf   : > { %1825 = shalt.err (!%p1822_p9)
}
  0xc0   : > { %s1826_s17 = scalar_lea.vmem %s2297_s27, 128  ;;  %s1999_s22 = smov [#allocation3]  }
  0xc1   : > { %p1827_p12 = scmp.ne.s32.totalorder %s2297_s27, %s1826_s17  ;;  %s1831_s8 = sshll.u32 %s1999_s22, 4  ;;  %s1832_s8 = int_to_ptr.vmem [resolvable:$false] %s1831_s8 }
  0xc2   : > { %s1833_s21 = scalar_lea.vmem %s1832_s8, 256  ;;  %p1834_p4 = scmp.lt.s32.totalorder %s2297_s27, %s1832_s8 }
  0xc3   : > { %p1829_p1 = pnand %p1827_p12, %p1813_p8  ;;  %p1835_p13 = scmp.lt.s32.totalorder %s1833_s21, %s1826_s17 }
  0xc5   : > { %p1830_p10 = pneg %p1829_p1  ;;  %p1836_p0 = por %p1835_p13, %p1834_p4 }
  0xc7   : > { %p1837_p2 = pnand %p1836_p0, %p1830_p10 }
  0xc9   : > { %1840 = shalt.err (!%p1837_p2)
}
  0xca   : > { %1539 = dma.hbm_to_vmem [thread:$0]  (!%p2301_p11), %s2295_s20, 128, %s2297_s27, %s354_s2  }
  0xcb   : > { %s1358_s28 = sshll.u32 %s1989_s12, 4  ;;  %s374_s29 = scalar_lea.vmem [#allocation6], %s2280_s13 }
  0xcc   : > { %s381_s25 = sshll.u32 %s374_s29, 4  ;;  %s2337_s8 = scalar_lea.hbm %s2570_s1, %s1358_s28  ;;  %s382_s25 = int_to_ptr.vmem [resolvable:$true] %s381_s25 }
  0xcd   : > { %s2602_s17 = sand.u32 1, %s1989_s12   ;;  %s1841_s3 = scalar_lea.hbm %s2337_s8, 16 }
  0xce   : > { %s372_s21 = scalar_lea.sflag [#allocation7], %s2602_s17  ;;  %p1842_p4 = scmp.ne.s32.totalorder %s2337_s8, %s1841_s3 }
  0xcf   : > { %s1846_s20 = scalar_lea.hbm %s2570_s1, 32  ;;  %p1847_p5 = scmp.lt.u32.totalorder %s2337_s8, %s2570_s1 }
  0xd0   : > { %p1844_p10 = pnand %p1842_p4, %p1813_p8  ;;  %p1848_p7 = scmp.lt.u32.totalorder %s1846_s20, %s1841_s3 }
  0xd1   : > { %p1850_p12 = scmp.lt.u32.totalorder %s1841_s3, %s2337_s8 }
  0xd2   : > { %p1845_p3 = pneg %p1844_p10  ;;  %p1849_p9 = por %p1848_p7, %p1847_p5 }
  0xd4   : > { %p1851_p1 = por %p1850_p12, %p1849_p9 }
  0xd6   : > { %p1852_p13 = pnand %p1851_p1, %p1845_p3 }
  0xd8   : > { %1855 = shalt.err (!%p1852_p13)
}
  0xd9   : > { %s1856_s28 = scalar_lea.vmem %s382_s25, 16  ;;  %s2000_s29 = smov [#allocation6]  }
  0xda   : > { %p1857_p0 = scmp.ne.s32.totalorder %s382_s25, %s1856_s28  ;;  %s1861_s22 = sshll.u32 %s2000_s29, 4  ;;  %s1862_s22 = int_to_ptr.vmem [resolvable:$false] %s1861_s22 }
  0xdb   : > { %s1863_s17 = scalar_lea.vmem %s1862_s22, 32  ;;  %p1864_p10 = scmp.lt.s32.totalorder %s382_s25, %s1862_s22 }
  0xdc   : > { %p1859_p2 = pnand %p1857_p0, %p1813_p8  ;;  %p1865_p6 = scmp.lt.s32.totalorder %s1863_s17, %s1856_s28 }
  0xde   : > { %p1860_p4 = pneg %p1859_p2  ;;  %p1866_p5 = por %p1865_p6, %p1864_p10 }
  0xe0   : > { %p1867_p7 = pnand %p1866_p5, %p1860_p4 }
  0xe2   : > { %1870 = shalt.err (!%p1867_p7)
}
  0xe3   : > { %1542 = dma.hbm_to_vmem [thread:$0]  (!%p2301_p11), %s2337_s8, 16, %s382_s25, %s372_s21  }
  0xe4   : > { %p2603_p3 = scmp.ne.s32.totalorder %s2589_s16, 0 }
  0xe5   : > { %s2363_s3 = sand.u32 (!%p2603_p3), 1, %s1981_s10   ;;  %p2604_p6 = scmp.ne.s32.totalorder (!%p2603_p3), %s2597_s24, 0 }
  0xe6   : > { %390 = sbr.rel (%p2603_p3) target bundleno = 2075 (0x81b), region = 52  ;;  %s2366_s2 = sshll.u32 (!%p2603_p3), %s2363_s3, 3 }
  0xe7   : > { %s393_s13 = scalar_lea.sflag (!%p2603_p3), [#allocation4], %s2363_s3  ;;  %s396_s20 = scalar_lea.vmem (!%p2603_p3), [#allocation3], %s2366_s2 }
  0xed   : > { %1944 = dma.done.wait (%p2604_p6), %s393_s13, 128  }
  0xee   : > { %1946 = vsyncadd (%p2604_p6), %s393_s13, 4294967168  ;;  %s401_s16 = sand.u32 1, %s2091_s15   ;;  %s404_s25 = scalar_lea.vmem [#allocation6], %s2363_s3 }
  0xef   : > { %s402_s23 = scalar_lea.sflag [#allocation7], %s401_s16 }
  0xf0   : > { %1948 = dma.done.wait (%p2604_p6), %s402_s23, 16  }
  0xf1   : > { %1950 = vsyncadd (%p2604_p6), %s402_s23, 4294967280  ;;  %p2605_p11 = scmp.eq.s32.totalorder %s2091_s15, 0 }
  0xf3   : > { %1952 = dma.done.wait (%p2605_p11), [#allocation7], 256   ;;  %p2606_p8 = pmov %p2605_p11 }
  0xf5   : > { %1954 = vsyncadd (%p2606_p8), [#allocation7], 4294967040  ;;  %p2607_p9 = pmov %p2606_p8 }
  0xf6   : > { %p2608_p12 = pmov %p2606_p8 }
  0xf7   : > { %1956 = dma.done.wait (%p2607_p9), [#allocation10], 272  }
  0xf8   : > { %1958 = vsyncadd (%p2608_p12), [#allocation10], 4294967024  ;;  %p2609_p1 = pmov %p2606_p8 }
  0xfa   : > { %1960 = dma.done.wait (%p2609_p1), [#allocation13], 32   ;;  %p2610_p13 = pmov %p2609_p1 }
  0xfb   : > { %p2611_p0 = pmov %p2609_p1 }
  0xfc   : > { %1962 = vsyncadd (%p2610_p13), [#allocation13], 4294967264 }
  0xfd   : > { %1964 = dma.done.wait (%p2611_p0), [#allocation16], 16   ;;  %p2612_p2 = pmov %p2611_p0 }
  0xfe   : > { %v2001_v0 = vmov 0.0   ;;  %vm2002_vm0 = vmmov 0   ;;  %v1621_v1 = vld [vmem:[#allocation8] sm:$0xff]   ;;  %v1622_v2 = vld [vmem:[#allocation8 + $0x8] sm:$0xff]   ;;  %vm498_vm1 = vcmask 261120   ;;  %s2003_s24 = smov 120   ;;  %v547_v23 = vlaneseq }
  0xff   : > { %1966 = vsyncadd (%p2612_p2), [#allocation16], 4294967280  ;;  %1421 = vmatprep.subr.bf16.mxu0 %v2001_v0  ;;  %1425 = vmatprep.mubr.msk.bf16.mxu0 %vm2002_vm0, %v2001_v0  ;;  %v2402_v3 = vld [vmem:[%s396_s20] sm:$0xff]  ;;  %s2004_s8 = smov 96   ;;  %s2005_s21 = smov 80   ;;  %vm555_vm2 = vcmask 64512  }
 0x100   : > { %1429 = vmatprep.subr.bf16.mxu1 %v2001_v0  ;;  %1431 = vmatprep.mubr.msk.bf16.mxu1 %vm2002_vm0, %v2001_v0  ;;  %v474_v4 = vpack.c.bf16 %v2402_v3, %v2402_v3  ;;  %v1369_v5 = vld [vmem:[#allocation9] ss:$0 sm:$0xff]  ;;  %s2006_s0 = smov 88   ;;  %s2007_s27 = smov 72   ;;  %v542_v24 = vld [vmem:[%s404_s25] sm:$0x1] }
 0x101   : > { %1422 = vmatpush3.bf16.msra.mxu0 %v1621_v1  ;;  %s2008_s28 = smov 112   ;;  %s2009_s29 = smov 104   ;;  %v548_v25 = vshrl.u32 %v547_v23, 7  ;;  %vm543_vm3 = vcmp.gt.f32.partialorder %v542_v24, 0.5  ;;  %v2010_v27 = vmov -1e+30  }
 0x102   : > { %1423 = vmatprep.subr.bf16.mxu0 %v2001_v0  ;;  %v544_v28 = vsel %vm543_vm3, 0.0, %v2010_v27  ;;  %s2011_s22 = smov 56   ;;  %s2012_s17 = smov 64   ;;  %vm619_vm4 = vcmask 1043456   ;;  %vm664_vm5 = vcmask 60416   ;;  %vm785_vm6 = vcmask 126016  }
 0x103   : > { %v549_v26 = vsub.s32 0, %v548_v25  ;;  %s2013_s13 = smov 40   ;;  %s2014_s20 = smov 48   ;;  %vm908_vm7 = vcmask 191616   ;;  %vm1031_vm8 = vcmask 257216  }
 0x104   : > { %s2456_s16 = scalar_lea.vmem [#allocation18], %s2366_s2  ;;  %s2015_s23 = smov 8  }
 0x105   : > { %1424 = vmatpush3.bf16.msra.mxu0 %v1622_v2  ;;  %v550_v29 = vrot.slane %v544_v28, %v549_v26  ;;  %s2016_s25 = smov 16   ;;  %p2613_p10 = scmp.ne.s32.totalorder %s2598_s14, 0 }
 0x106   : > { %1435 = vmatprep.subr.bf16.mxu0 %v2001_v0 }
 0x108   : > { %1426 = vmatmul.mubr.msk.bf16.vlgmr.msra.gmra.mrb[0].mxu0 %vm498_vm1, %v474_v4 }
 0x109   : > { %1437 = vmatprep.mubr.msk.bf16.mxu0 %vm2002_vm0, %v2001_v0 }
 0x1db   : > { %v536_v6 = vpop.f32.mrb[0].mxu0 }
 0x1dc   : > { %v537_v7 = vadd.f32 %v1369_v5, %v536_v6  ;;  %v1427_v8 = vpop.f32.mrb[1].mxu0 }
 0x1dd   : > { %v539_v9 = vpop.f32.mrb[2].mxu0 }
 0x1de   : > { %v2411_v10 = vpack.c.bf16 %v537_v7, %v537_v7  ;;  %v1428_v11 = vpop.f32.mrb[3].mxu0 }
 0x1e0   : > { %668 = vrot.lane.b32.xlu1 %v2411_v10, %s2003_s24  ;;  %553 = vrot.lane.b32.xlu0 %v2411_v10, %s2004_s8  ;;  %s2017_s24 = smov 24   ;;  %s1392_s8 = sshll.u32 %s2091_s15, 7 }
 0x1e4   : > { %793 = vrot.lane.b32.xlu1 %v2411_v10, %s2005_s21  ;;  %670 = vrot.lane.b32.xlu0 %v2411_v10, %s2006_s0 }
 0x1e8   : > { %916 = vrot.lane.b32.xlu1 %v2411_v10, %s2007_s27  ;;  %791 = vrot.lane.b32.xlu0 %v2411_v10, %s2008_s28  ;;  %s2497_s27 = scalar_lea.hbm %s2578_s9, %s1392_s8  ;;  %s1168_s28 = sshll.u32 %s2456_s16, 4  ;;  %s1169_s28 = int_to_ptr.vmem [resolvable:$true] %s1168_s28 }
 0x1ec   : > { %914 = vrot.lane.b32.xlu0 %v2411_v10, %s2009_s29  ;;  %s1142_s29 = scalar_lea.sflag [#allocation19], %s2363_s3 }
 0x252   : > { %v554_v12 = vpop.permute.xlu0 %553  ;;  %v669_v15 = vpop.permute.xlu1 %668 }
 0x253   : > { %v560_v13 = vsel %vm555_vm2, %v554_v12, 0 }
 0x254   : > { %1430 = vmatpush3.bf16.xpose.msra.mxu1 %v560_v13 }
 0x255   : > { %1441 = vmatprep.subr.bf16.mxu1 %v2001_v0 }
 0x256   : > { %v671_v14 = vpop.permute.xlu0 %670  ;;  %v794_v17 = vpop.permute.xlu1 %793 }
 0x257   : > { %v676_v16 = vsel %vm555_vm2, %v671_v14, 0  ;;  %v799_v18 = vsel %vm555_vm2, %v794_v17, 0 }
 0x25a   : > { %v917_v19 = vpop.permute.xlu1 %916  ;;  %v792_v20 = vpop.permute.xlu0 %791 }
 0x25b   : > { %1432 = vmatmul.mubr.msk.bf16.vlgmr.msra.gmra.mrb[0].mxu1 %vm555_vm2, %v2411_v10  ;;  %v922_v21 = vsel %vm555_vm2, %v917_v19, 0 }
 0x25c   : > { %1442 = vmatpush3.bf16.xpose.msra.mxu1 %v676_v16  ;;  %1443 = vmatprep.mubr.msk.bf16.mxu1 %vm2002_vm0, %v2001_v0 }
 0x25d   : > { %1453 = vmatprep.subr.bf16.mxu1 %v2001_v0 }
 0x25e   : > { %v915_v22 = vpop.permute.xlu0 %914 }
 0x263   : > { %1444 = vmatmul.mubr.msk.bf16.vlgmr.msra.gmra.mrb[4].mxu1 %vm555_vm2, %v669_v15 }
 0x264   : > { %1454 = vmatpush3.bf16.xpose.msra.mxu1 %v799_v18  ;;  %1455 = vmatprep.mubr.msk.bf16.mxu1 %vm2002_vm0, %v2001_v0 }
 0x265   : > { %1465 = vmatprep.subr.bf16.mxu1 %v2001_v0 }
 0x26b   : > { %1456 = vmatmul.mubr.msk.bf16.vlgmr.msra.gmra.mrb[8].mxu1 %vm555_vm2, %v792_v20 }
 0x26c   : > { %1466 = vmatpush3.bf16.xpose.msra.mxu1 %v922_v21  ;;  %1467 = vmatprep.mubr.msk.bf16.mxu1 %vm2002_vm0, %v2001_v0 }
 0x26d   : > { %1477 = vmatprep.subr.bf16.mxu1 %v2001_v0 }
 0x273   : > { %1468 = vmatmul.mubr.msk.bf16.vlgmr.msra.gmra.mrb[12].mxu1 %vm555_vm2, %v915_v22 }
 0x274   : > { %1481 = vmatprep.mubr.msk.bf16.mxu1 %vm2002_vm0, %v2001_v0 }
 0x32e   : > { %v596_v30 = vpop.f32.mrb[0].mxu1 }
 0x32f   : > { %v597_v31 = vadd.f32 %v596_v30, %v550_v29  ;;  %v1433_v32 = vpop.f32.mrb[1].mxu1 }
 0x330   : > { %v599_v33 = vpop.f32.mrb[2].mxu1 }
 0x331   : > { %v1434_v34 = vpop.f32.mrb[3].mxu1  ;;  %v602_v35 = vsel %vm555_vm2, %v597_v31, -inf }
 0x332   : > { %603 = vmax.xlane.f32.xlu1 %v602_v35 }
 0x336   : > { %v712_v36 = vpop.f32.mrb[4].mxu1 }
 0x337   : > { %v713_v37 = vadd.f32 %v712_v36, %v550_v29  ;;  %v1445_v38 = vpop.f32.mrb[5].mxu1 }
 0x338   : > { %v715_v39 = vpop.f32.mrb[6].mxu1 }
 0x339   : > { %v1446_v40 = vpop.f32.mrb[7].mxu1  ;;  %v718_v41 = vsel %vm555_vm2, %v713_v37, -inf }
 0x33a   : > { %719 = vmax.xlane.f32.xlu0 %v718_v41 }
 0x33e   : > { %v835_v42 = vpop.f32.mrb[8].mxu1 }
 0x33f   : > { %v836_v43 = vadd.f32 %v835_v42, %v550_v29  ;;  %v1457_v44 = vpop.f32.mrb[9].mxu1 }
 0x340   : > { %v838_v45 = vpop.f32.mrb[10].mxu1 }
 0x341   : > { %v1458_v46 = vpop.f32.mrb[11].mxu1  ;;  %v841_v47 = vsel %vm555_vm2, %v836_v43, -inf }
 0x342   : > { %842 = vmax.xlane.f32.xlu0 %v841_v47 }
 0x346   : > { %v958_v48 = vpop.f32.mrb[12].mxu1 }
 0x347   : > { %v959_v49 = vadd.f32 %v958_v48, %v550_v29  ;;  %v1469_v50 = vpop.f32.mrb[13].mxu1 }
 0x348   : > { %v961_v51 = vpop.f32.mrb[14].mxu1 }
 0x349   : > { %v1470_v52 = vpop.f32.mrb[15].mxu1  ;;  %v964_v53 = vsel %vm555_vm2, %v959_v49, -inf }
 0x34a   : > { %965 = vmax.xlane.f32.xlu1 %v964_v53 }
 0x3bf   : > { %v604_v54 = vpop.xlane.xlu1 %603 }
 0x3c0   : > { %v605_v55 = vsub.f32 %v597_v31, %v604_v54 }
 0x3c2   : > { %v606_v56 = vmul.f32 1.442695, %v605_v55 }
 0x3c4   : > { %1625 = vpow2.f32 %v606_v56  ;;  %v1623_v56 = vld [vmem:[#allocation11] sm:$0xff]  }
 0x3c5   : > { %1478 = vmatpush3.bf16.msra.mxu1 %v1623_v56 }
 0x3c6   : > { %1479 = vmatprep.subr.bf16.mxu1 %v2001_v0 }
 0x3c7   : > { %v720_v57 = vpop.xlane.xlu0 %719 }
 0x3c8   : > { %v721_v58 = vsub.f32 %v713_v37, %v720_v57  ;;  %v1624_v57 = vld [vmem:[#allocation11 + $0x8] sm:$0xff]  }
 0x3c9   : > { %1480 = vmatpush3.bf16.msra.mxu1 %v1624_v57 }
 0x3ca   : > { %v722_v59 = vmul.f32 1.442695, %v721_v58 }
 0x3cc   : > { %1627 = vpow2.f32 %v722_v59 }
 0x3ce   : > { %v1626_v60 = vpop.eup %1625 }
 0x3cf   : > { %v843_v61 = vpop.xlane.xlu0 %842  ;;  %v608_v62 = vsel %vm555_vm2, %v1626_v60, 0.0 }
 0x3d0   : > { %v844_v63 = vsub.f32 %v836_v43, %v843_v61  ;;  %609 = vadd.xlane.f32.xlu0 %v608_v62 }
 0x3d2   : > { %v845_v1 = vmul.f32 1.442695, %v844_v63 }
 0x3d4   : > { %1629 = vpow2.f32 %v845_v1 }
 0x3d6   : > { %v1628_v2 = vpop.eup %1627 }
 0x3d7   : > { %v724_v4 = vsel %vm555_vm2, %v1628_v2, 0.0  ;;  %v966_v7 = vpop.xlane.xlu1 %965 }
 0x3d8   : > { %725 = vadd.xlane.f32.xlu1 %v724_v4  ;;  %v967_v8 = vsub.f32 %v959_v49, %v966_v7 }
 0x3da   : > { %v968_v9 = vmul.f32 1.442695, %v967_v8 }
 0x3dc   : > { %1631 = vpow2.f32 %v968_v9  ;;  %v1384_v9 = vld [vmem:[#allocation12] ss:$0 sm:$0xff] }
 0x3de   : > { %v1630_v5 = vpop.eup %1629 }
 0x3df   : > { %v847_v6 = vsel %vm555_vm2, %v1630_v5, 0.0 }
 0x3e0   : > { %848 = vadd.xlane.f32.xlu0 %v847_v6 }
 0x3e6   : > { %v1632_v11 = vpop.eup %1631 }
 0x3e7   : > { %v970_v12 = vsel %vm555_vm2, %v1632_v11, 0.0 }
 0x3e9   : > { %730 = vrot.lane.b32.xlu1 %v2411_v10, %s2011_s22  ;;  %s1871_s22 = scalar_lea.vmem %s1169_s28, 128 }
 0x3ea   : > { %p1872_p4 = scmp.ne.s32.totalorder %s1169_s28, %s1871_s22 }
 0x3ec   : > { %p1873_p5 = pnand %p1872_p4, %p2613_p10 }
 0x3ee   : > { %p1874_p7 = pneg %p1873_p5 }
 0x3f6   : > { %614 = vrot.lane.b32.xlu0 %v2411_v10, %s2012_s17  ;;  %s2018_s17 = smov [#allocation18]  }
 0x3fa   : > { %976 = vrot.lane.b32.xlu0 %v2411_v10, %s2013_s13  ;;  %s1875_s13 = sshll.u32 %s2018_s17, 4  ;;  %s1876_s13 = int_to_ptr.vmem [resolvable:$false] %s1875_s13 }
 0x3fb   : > { %p1878_p3 = scmp.lt.s32.totalorder %s1169_s28, %s1876_s13 }
 0x40d   : > { %971 = vadd.xlane.f32.xlu1 %v970_v12 }
 0x41e   : > { %853 = vrot.lane.b32.xlu1 %v2411_v10, %s2014_s20  ;;  %s1877_s20 = scalar_lea.vmem %s1876_s13, 256 }
 0x41f   : > { %p1879_p6 = scmp.lt.s32.totalorder %s1877_s20, %s1871_s22 }
 0x421   : > { %p1880_p11 = por %p1879_p6, %p1878_p3 }
 0x423   : > { %p1881_p8 = pnand %p1880_p11, %p1874_p7 }
 0x45d   : > { %v610_v13 = vpop.xlane.xlu0 %609 }
 0x45e   : > { %1633 = vrcp.f32 %v610_v13 }
 0x465   : > { %v726_v14 = vpop.xlane.xlu1 %725 }
 0x466   : > { %1635 = vrcp.f32 %v726_v14 }
 0x468   : > { %v1634_v15 = vpop.eup %1633 }
 0x469   : > { %v612_v16 = vmul.f32 %v1634_v15, %v1626_v60  ;;  %v731_v23 = vpop.permute.xlu1 %730 }
 0x46a   : > { %v736_v27 = vsel %vm619_vm4, %v731_v23, 0 }
 0x46b   : > { %v666_v17 = vmul.f32 0.25, %v612_v16  ;;  %v613_v25 = vpack.c.bf16 %v612_v16, %v612_v16 }
 0x46d   : > { %667 = vst.msk [vmem:[%s2456_s16] sm:$0xff] %vm555_vm2, %v666_v17  ;;  %v849_v18 = vpop.xlane.xlu0 %848 }
 0x46e   : > { %1637 = vrcp.f32 %v849_v18 }
 0x470   : > { %v1636_v19 = vpop.eup %1635 }
 0x471   : > { %v728_v20 = vmul.f32 %v1636_v19, %v1628_v2  ;;  %v615_v10 = vpop.permute.xlu0 %614 }
 0x472   : > { %v621_v21 = vsel %vm619_vm4, %v615_v10, 0 }
 0x473   : > { %v788_v22 = vmul.f32 0.25, %v728_v20  ;;  %1436 = vmatpush3.bf16.msra.mxu0 %v621_v21  ;;  %v729_v30 = vpack.c.bf16 %v728_v20, %v728_v20 }
 0x474   : > { %v787_v24 = vld [vmem:[%s2456_s16] sm:$0xff]  ;;  %1447 = vmatprep.subr.bf16.mxu0 %v2001_v0 }
 0x475   : > { %v789_v26 = vadd.f32 %v788_v22, %v787_v24  ;;  %v977_v37 = vpop.permute.xlu0 %976 }
 0x476   : > { %1438 = vmatmul.mubr.msk.bf16.vlgmr.msra.gmra.mrb[4].mxu0 %vm555_vm2, %v613_v25  ;;  %v982_v39 = vsel %vm619_vm4, %v977_v37, 0 }
 0x477   : > { %790 = vst.msk [vmem:[%s2456_s16] sm:$0xff] %vm555_vm2, %v789_v26  ;;  %1448 = vmatpush3.bf16.msra.mxu0 %v736_v27  ;;  %1449 = vmatprep.mubr.msk.bf16.mxu0 %vm2002_vm0, %v2001_v0 }
 0x478   : > { %v1638_v28 = vpop.eup %1637  ;;  %1459 = vmatprep.subr.bf16.mxu0 %v2001_v0 }
 0x479   : > { %v851_v29 = vmul.f32 %v1638_v28, %v1630_v5 }
 0x47b   : > { %v911_v31 = vmul.f32 0.25, %v851_v29  ;;  %v852_v38 = vpack.c.bf16 %v851_v29, %v851_v29 }
 0x47e   : > { %v910_v32 = vld [vmem:[%s2456_s16] sm:$0xff]  ;;  %1450 = vmatmul.mubr.msk.bf16.vlgmr.msra.gmra.mrb[8].mxu0 %vm555_vm2, %v729_v30 }
 0x47f   : > { %v912_v33 = vadd.f32 %v911_v31, %v910_v32  ;;  %1461 = vmatprep.mubr.msk.bf16.mxu0 %vm2002_vm0, %v2001_v0 }
 0x481   : > { %913 = vst.msk [vmem:[%s2456_s16] sm:$0xff] %vm555_vm2, %v912_v33 }
 0x488   : > { %v1033_v44 = vld [vmem:[%s2456_s16] sm:$0xff] }
 0x49a   : > { %v972_v34 = vpop.xlane.xlu1 %971 }
 0x49b   : > { %1639 = vrcp.f32 %v972_v34 }
 0x49e   : > { %v854_v35 = vpop.permute.xlu1 %853 }
 0x49f   : > { %v859_v36 = vsel %vm619_vm4, %v854_v35, 0 }
 0x4a0   : > { %1460 = vmatpush3.bf16.msra.mxu0 %v859_v36 }
 0x4a1   : > { %1471 = vmatprep.subr.bf16.mxu0 %v2001_v0 }
 0x4a3   : > { %1462 = vmatmul.mubr.msk.bf16.vlgmr.msra.gmra.mrb[12].mxu0 %vm555_vm2, %v852_v38 }
 0x4a4   : > { %1472 = vmatpush3.bf16.msra.mxu0 %v982_v39  ;;  %1473 = vmatprep.mubr.msk.bf16.mxu0 %vm2002_vm0, %v2001_v0 }
 0x4a5   : > { %v1640_v40 = vpop.eup %1639 }
 0x4a6   : > { %v974_v41 = vmul.f32 %v1640_v40, %v1632_v11 }
 0x4a8   : > { %v1034_v42 = vmul.f32 0.25, %v974_v41  ;;  %v975_v43 = vpack.c.bf16 %v974_v41, %v974_v41 }
 0x4aa   : > { %v1035_v45 = vadd.f32 %v1034_v42, %v1033_v44 }
 0x4ab   : > { %1474 = vmatmul.mubr.msk.bf16.vlgmr.msra.gmra.mrb[16].mxu0 %vm555_vm2, %v975_v43 }
 0x4ac   : > { %1036 = vst.msk [vmem:[%s2456_s16] sm:$0xff] %vm555_vm2, %v1035_v45 }
 0x549   : > { %v657_v46 = vpop.f32.mrb[4].mxu0 }
 0x54a   : > { %v663_v47 = vpack.c.bf16 %v657_v46, %v657_v46  ;;  %v1439_v48 = vpop.f32.mrb[5].mxu0 }
 0x54b   : > { %v660_v49 = vpop.f32.mrb[6].mxu0 }
 0x54c   : > { %665 = vst.msk [vmem:[#allocation2] sm:$0xf] %vm664_vm5, %v663_v47  ;;  %v1440_v50 = vpop.f32.mrb[7].mxu0 }
 0x551   : > { %v772_v51 = vpop.f32.mrb[8].mxu0 }
 0x552   : > { %v1396_v52 = vpack.c.bf16 %v772_v51, %v772_v51  ;;  %v1451_v53 = vpop.f32.mrb[9].mxu0 }
 0x553   : > { %v775_v54 = vpop.f32.mrb[10].mxu0 }
 0x554   : > { %782 = vrot.lane.b32.xlu1 %v1396_v52, %s2015_s23  ;;  %v1452_v55 = vpop.f32.mrb[11].mxu0 }
 0x576   : > { %v895_v58 = vpop.f32.mrb[12].mxu0 }
 0x577   : > { %v1397_v59 = vpack.c.bf16 %v895_v58, %v895_v58  ;;  %v1463_v60 = vpop.f32.mrb[13].mxu0 }
 0x578   : > { %v898_v61 = vpop.f32.mrb[14].mxu0 }
 0x579   : > { %905 = vrot.lane.b32.xlu0 %v1397_v59, %s2016_s25  ;;  %v1464_v62 = vpop.f32.mrb[15].mxu0 }
 0x57e   : > { %v1018_v63 = vpop.f32.mrb[16].mxu0 }
 0x57f   : > { %v1398_v1 = vpack.c.bf16 %v1018_v63, %v1018_v63  ;;  %v1475_v2 = vpop.f32.mrb[17].mxu0 }
 0x580   : > { %v1021_v4 = vpop.f32.mrb[18].mxu0 }
 0x581   : > { %1028 = vrot.lane.b32.xlu1 %v1398_v1, %s2017_s24  ;;  %v1476_v5 = vpop.f32.mrb[19].mxu0 }
 0x5c6   : > { %v783_v6 = vpop.permute.xlu1 %782 }
 0x5c7   : > { %786 = vst.msk [vmem:[#allocation2] sm:$0xf] %vm785_vm6, %v783_v6 }
 0x5eb   : > { %v906_v7 = vpop.permute.xlu0 %905 }
 0x5ec   : > { %909 = vst.msk [vmem:[#allocation2] sm:$0xf] %vm908_vm7, %v906_v7 }
 0x5f3   : > { %v1029_v0 = vpop.permute.xlu1 %1028 }
 0x5f4   : > { %1032 = vst.msk [vmem:[#allocation2] sm:$0xf] %vm1031_vm8, %v1029_v0 }
 0x5fb   : > { %v1037_v8 = vld [vmem:[#allocation2] sm:$0xf] }
 0x5fc   : > { %1482 = vmatmul.mubr.msk.bf16.vlgmr.msra.gmra.mrb[16].mxu1 %vm498_vm1, %v1037_v8 }
 0x6cf   : > { %v1098_v11 = vpop.f32.mrb[16].mxu1 }
 0x6d0   : > { %v1099_v12 = vadd.f32 %v1384_v9, %v1098_v11  ;;  %v1483_v13 = vpop.f32.mrb[17].mxu1 }
 0x6d1   : > { %v1101_v14 = vpop.f32.mrb[18].mxu1 }
 0x6d2   : > { %v1484_v15 = vpop.f32.mrb[19].mxu1  ;;  %v1104_v16 = vadd.f32 %v1099_v12, %v2402_v3 }
 0x6d4   : > { %v1105_v17 = vsel %vm498_vm1, %v1104_v16, 0.0 }
 0x6d5   : > { %1106 = vadd.xlane.f32.xlu0 %v1105_v17 }
 0x762   : > { %v1107_v18 = vpop.xlane.xlu0 %1106 }
 0x763   : > { %v1109_v19 = vmul.f32 0.03125, %v1107_v18 }
 0x765   : > { %v1110_v20 = vsub.f32 %v1104_v16, %v1109_v19 }
 0x767   : > { %v1111_v10 = vmul.f32 %v1110_v20, %v1110_v20 }
 0x769   : > { %v1112_v21 = vsel %vm498_vm1, %v1111_v10, 0.0 }
 0x76a   : > { %1113 = vadd.xlane.f32.xlu1 %v1112_v21 }
 0x76b   : > { %1884 = shalt.err (!%p1881_p8)
}
 0x76c   : > { %s1885_s16 = scalar_lea.hbm %s2497_s27, 128  ;;  %s1889_s24 = scalar_lea.hbm %s2578_s9, 256 }
 0x76d   : > { %p1886_p9 = scmp.ne.s32.totalorder %s2497_s27, %s1885_s16  ;;  %p1890_p13 = scmp.lt.u32.totalorder %s2497_s27, %s2578_s9 }
 0x76e   : > { %p1891_p0 = scmp.lt.u32.totalorder %s1889_s24, %s1885_s16  ;;  %p1893_p4 = scmp.lt.u32.totalorder %s1885_s16, %s2497_s27 }
 0x76f   : > { %p1887_p12 = pnand %p1886_p9, %p2613_p10 }
 0x770   : > { %p1892_p2 = por %p1891_p0, %p1890_p13 }
 0x771   : > { %p1888_p1 = pneg %p1887_p12 }
 0x772   : > { %p1894_p5 = por %p1893_p4, %p1892_p2 }
 0x774   : > { %p1895_p7 = pnand %p1894_p5, %p1888_p1 }
 0x776   : > { %1898 = shalt.err (!%p1895_p7)
}
 0x777   : > { %1514 = dma.vmem_to_hbm [thread:$0]  (%p2613_p10), %s1169_s28, 128, %s2497_s27, %s1142_s29   ;;  %v1388_v25 = vld [vmem:[#allocation14] ss:$0 sm:$0xff]  ;;  %v1389_v27 = vld [vmem:[#allocation15] ss:$0 sm:$0xff] }
 0x778   : > { %s464_s22 = scalar_lea.vmem [#allocation17], %s2366_s2  ;;  %s2614_s16 = sld [smem:[#allocation31_spill]] }
 0x779   : > { %s1155_s17 = sshll.u32 %s464_s22, 4  ;;  %s1137_s27 = scalar_lea.sflag [#allocation5], %s2363_s3  ;;  %s2526_s17 = int_to_ptr.vmem [resolvable:$true] %s1155_s17 }
 0x77a   : > { %s1899_s28 = scalar_lea.vmem %s2526_s17, 128  ;;  %s2019_s2 = smov [#allocation17]  }
 0x77b   : > { %p1900_p3 = scmp.ne.s32.totalorder %s2526_s17, %s1899_s28  ;;  %s1903_s15 = sshll.u32 %s2019_s2, 4  ;;  %s1904_s15 = int_to_ptr.vmem [resolvable:$false] %s1903_s15 }
 0x77c   : > { %s1905_s29 = scalar_lea.vmem %s1904_s15, 256  ;;  %p1906_p8 = scmp.lt.s32.totalorder %s2526_s17, %s1904_s15 }
 0x77d   : > { %p1901_p6 = pnand %p1900_p3, %p2613_p10  ;;  %p1907_p9 = scmp.lt.s32.totalorder %s1905_s29, %s1899_s28 }
 0x77e   : > { %s2524_s23 = scalar_lea.hbm %s2614_s16, %s1392_s8 }
 0x77f   : > { %p1902_p11 = pneg %p1901_p6  ;;  %p1908_p12 = por %p1907_p9, %p1906_p8 }
 0x781   : > { %p1909_p1 = pnand %p1908_p12, %p1902_p11 }
 0x7f7   : > { %v1114_v3 = vpop.xlane.xlu1 %1113 }
 0x7f8   : > { %v1115_v22 = vmul.f32 0.03125, %v1114_v3 }
 0x7fa   : > { %v1116_v23 = vadd.f32 1e-05, %v1115_v22 }
 0x7fc   : > { %1641 = vrsqrt.f32 %v1116_v23 }
 0x806   : > { %v1642_v24 = vpop.eup %1641 }
 0x807   : > { %v1118_v26 = vmul.f32 %v1642_v24, %v1110_v20 }
 0x809   : > { %v1126_v28 = vmul.f32 %v1388_v25, %v1118_v26 }
 0x80b   : > { %v1134_v29 = vadd.f32 %v1389_v27, %v1126_v28 }
 0x80d   : > { %1135 = vst.msk [vmem:[%s464_s22] sm:$0xff] %vm498_vm1, %v1134_v29 }
 0x80e   : > { %1912 = shalt.err (!%p1909_p1)
}
 0x80f   : > { %s1913_s3 = scalar_lea.hbm %s2524_s23, 128  ;;  %s1917_s24 = scalar_lea.hbm %s2614_s16, 256 }
 0x810   : > { %p1914_p13 = scmp.ne.s32.totalorder %s2524_s23, %s1913_s3  ;;  %p1918_p4 = scmp.lt.u32.totalorder %s2524_s23, %s2614_s16 }
 0x811   : > { %p1919_p5 = scmp.lt.u32.totalorder %s1917_s24, %s1913_s3  ;;  %p1921_p3 = scmp.lt.u32.totalorder %s1913_s3, %s2524_s23 }
 0x812   : > { %p1915_p0 = pnand %p1914_p13, %p2613_p10 }
 0x813   : > { %p1920_p7 = por %p1919_p5, %p1918_p4 }
 0x814   : > { %p1916_p2 = pneg %p1915_p0 }
 0x815   : > { %p1922_p6 = por %p1921_p3, %p1920_p7 }
 0x817   : > { %p1923_p11 = pnand %p1922_p6, %p1916_p2 }
 0x819   : > { %1926 = shalt.err (!%p1923_p11)
}
 0x81a   : > { %1513 = dma.vmem_to_hbm [thread:$0]  (%p2613_p10), %s2526_s17, 128, %s2524_s23, %s1137_s27  }
 0x81b PF: > { %s1180_s22 = sand.u32 1, %s1977_s30   ;;  %p2615_p8 = scmp.ne.s32.totalorder %s2599_s18, 0 }
 0x81c   : > { %p2616_p9 = scmp.ge.s32.totalorder %s1989_s12, 2  ;;  %s1181_s13 = scalar_lea.sflag [#allocation5], %s1180_s22 }
 0x81e   : > { %p1544_p12 = pnand %p2616_p9, %p2615_p8 }
 0x820   : > { %1968 = dma.done.wait (!%p1544_p12), %s1181_s13, 128  }
 0x821   : > { %1970 = vsyncadd (!%p1544_p12), %s1181_s13, 4294967168  ;;  %s1190_s20 = scalar_lea.sflag [#allocation19], %s1180_s22 }
 0x822   : > { %1972 = dma.done.wait (!%p1544_p12), %s1190_s20, 128  }
 0x823   : > { %1974 = vsyncadd (!%p1544_p12), %s1190_s20, 4294967168  ;;  %p32_p10 = scmp.ge.s32.totalorder %s2254_s19, 4   ;;  %s2617_s30 = smov %s1981_s10 }
 0x824   : > { %s2618_s10 = smov %s1985_s11  ;;  %s2619_s11 = smov %s2265_s26 }
 0x825   : > { %s2620_s12 = smov %s2254_s19  ;;  %34 = sbr.rel (!%p32_p10) target bundleno = 17 (0x11), region = 151 }
 0x82c   :  { %1195 = vsyncpa [#allocation4], 1 }
 0x82d   :  { %1197 = vsyncpa [#allocation4 + $0x1], 1 }
 0x82e   :  { %1198 = vsyncpa [#allocation7], 1 }
 0x82f   :  { %1200 = vsyncpa [#allocation7 + $0x1], 1 }
 0x830   :  { %1201 = vsyncpa [#allocation10], 1 }
 0x831   :  { %1202 = vsyncpa [#allocation13], 1 }
 0x832   :  { %1203 = vsyncpa [#allocation16], 1 }
 0x833   :  { %1204 = vsyncpa [#allocation5], 1 }
 0x834   :  { %1206 = vsyncpa [#allocation5 + $0x1], 1 }
 0x835   :  { %1207 = vsyncpa [#allocation19], 1 }
 0x836   :  { %1209 = vsyncpa [#allocation19 + $0x1], 1 }

</bundles_post_ra>
